<compile_context>
chip_gen: v7x
topology: tpu7x:2x2x1
jax: 0.10.0
libtpu: 0.0.40
codegen_flags: <defaults>
</compile_context>

<pallas_src>
import jax
import jax.numpy as jnp
from jax import lax
from jax.experimental import pallas as pl
from jax.experimental.pallas import tpu as pltpu

BN_EPS = 1e-5
PAD = 8            # one sublane tile of (zero) top halo per sample


# ---------------------------------------------------------------- fused kernel
def _make_kernel(M, Cout, WC, inv_cnt):
    """M = N*(H+PAD) padded rows, WC = W*Cout output lanes."""

    def kernel(x_ref, B1_ref, B2_ref, g1_ref, be1_ref, g2_ref, be2_ref,
               G2_ref, hsel_ref, mask_ref, o_ref):
        mask = mask_ref[...]                       # (M, WC): 1.0 on interior rows

        def conv(A, B_ref):
            # 3x3 conv = 3 batched MXU matmuls over the full slab; the banded
            # (Toeplitz) RHS realizes the W-direction zero padding; the +/-1-row
            # H tap shift is an XLU sublane roll whose wrap hits zeroed halo rows.
            z0 = jnp.dot(A, B_ref[0], preferred_element_type=jnp.float32)
            z1 = jnp.dot(A, B_ref[1], preferred_element_type=jnp.float32)
            z2 = jnp.dot(A, B_ref[2], preferred_element_type=jnp.float32)
            return (pltpu.roll(z0, shift=1, axis=0) + z1 +
                    pltpu.roll(z2, shift=M - 1, axis=0))

        def bn_relu(Y, gamma, beta):
            # train-mode BatchNorm over interior rows only (mask), then ReLU.
            Ym = Y * mask
            s = jnp.sum(Ym, axis=0, keepdims=True)            # (1, WC)
            ss = jnp.sum(Ym * Ym, axis=0, keepdims=True)      # (1, WC)
            st = jnp.concatenate([s, ss], axis=1)             # (1, 2*WC), lane-aligned
            folded = jnp.dot(st, G2_ref[...],
                             preferred_element_type=jnp.float32) * inv_cnt
            mean = folded[:, :WC]
            var = folded[:, WC:] - mean * mean                # biased var (train mode)
            scale = lax.rsqrt(var + BN_EPS) * gamma
            # re-mask so halo rows are exact zeros for the next conv's H padding
            return jnp.maximum((Y - mean) * scale + beta, 0.0) * mask

        a1 = bn_relu(conv(x_ref[...], B1_ref), g1_ref[...], be1_ref[...])
        a2 = bn_relu(conv(a1, B2_ref), g2_ref[...], be2_ref[...])

        # 2x2 / stride-2 max pool: lane-group roll+max (W), sublane roll+max (H),
        # then one selector matmul picks the even interior rows -> lane-dense out.
        wmax = jnp.maximum(a2, pltpu.roll(a2, shift=WC - Cout, axis=1))
        hwmax = jnp.maximum(wmax, pltpu.roll(wmax, shift=M - 1, axis=0))
        o_ref[...] = jnp.dot(hsel_ref[...], hwmax,
                             preferred_element_type=jnp.float32)

    return kernel


# ----------------------------------------------- wrapper-side constant builders
def _banded_weights(w_oihw, W):
    # (Cout, Cin, 3, 3) -> (3, W*Cin, W*Cout) banded matrices (one per kh):
    # B[kh][u*Cin+ci, w*Cout+co] = w[co, ci, kh, u-w+1] inside the band, else 0.
    # Band clipping at u in [0, W) realizes the W-direction zero padding.
    Cout, Cin, KH, KW = w_oihw.shape
    u = jnp.arange(W)[:, None]
    wv = jnp.arange(W)[None, :]
    kw = u - wv + 1
    valid = (kw >= 0) & (kw < KW)
    w_k = jnp.take(w_oihw, jnp.clip(kw, 0, KW - 1), axis=3)      # (Cout,Cin,KH,W,W)
    w_k = jnp.where(valid[None, None, None], w_k, 0.0)
    B = jnp.transpose(w_k, (2, 3, 1, 4, 0))                      # (KH, u, Cin, w, Cout)
    return B.reshape(KH, W * Cin, W * Cout).astype(jnp.float32)


def _row_selector(N, H, HP):
    # (N*H/2, N*HP): row n*(H/2)+q selects padded-slab row n*HP + PAD + 2*q.
    rows = jnp.arange(N * (H // 2))
    cols = (rows // (H // 2)) * HP + PAD + 2 * (rows % (H // 2))
    return jnp.zeros((N * (H // 2), N * HP), jnp.float32).at[rows, cols].set(1.0)


# ------------------------------------------------------------- module wrapper
def downsample_block(x_nchw, p):
    N, Cin, H, W = x_nchw.shape
    Cout = p["w1"].shape[0]
    HP = H + PAD
    M = N * HP
    WC = W * Cout

    # NCHW -> lane-dense (rows = padded H, lanes = W*Cin) slab; halo rows zero.
    x_nhwc = jnp.transpose(x_nchw, (0, 2, 3, 1)).astype(jnp.float32)
    x_slab = jnp.zeros((N, HP, W * Cin), jnp.float32)
    x_slab = x_slab.at[:, PAD:PAD + H, :].set(x_nhwc.reshape(N, H, W * Cin))
    x_slab = x_slab.reshape(M, W * Cin)

    B1 = _banded_weights(p["w1"], W)                          # (3, W*Cin, WC)
    B2 = _banded_weights(p["w2"], W)                          # (3, WC,    WC)
    G = jnp.tile(jnp.eye(Cout, dtype=jnp.float32), (W, W))    # channel fold+bcast
    G2 = jnp.kron(jnp.eye(2, dtype=jnp.float32), G)           # blockdiag for [s | ss]
    hsel = _row_selector(N, H, HP)                            # (N*H/2, M)
    mask = jnp.broadcast_to(
        ((jnp.arange(M) % HP) >= PAD).astype(jnp.float32)[:, None], (M, WC))
    tilec = lambda v: jnp.tile(v.astype(jnp.float32), W).reshape(1, WC)

    vspec = pl.BlockSpec(memory_space=pltpu.MemorySpace.VMEM)
    pooled = pl.pallas_call(
        _make_kernel(M, Cout, WC, 1.0 / float(N * H * W)),
        out_shape=jax.ShapeDtypeStruct((N * (H // 2), WC), jnp.float32),
        in_specs=[vspec] * 10,
        out_specs=vspec,
    )(x_slab, B1, B2,
      tilec(p["g1"]), tilec(p["be1"]), tilec(p["g2"]), tilec(p["be2"]),
      G2, hsel, mask)

    # lanes are [w, c]; even w-groups hold the 2x2-pooled value -> select + NCHW.
    out = pooled.reshape(N, H // 2, W // 2, 2, Cout)[:, :, :, 0, :]
    return jnp.transpose(out, (0, 3, 1, 2))                   # (N, Cout, H/2, W/2)


# ------------------------- pure-JAX reference (mirrors the PyTorch forward) --
def reference(x, p):
    def conv(x, w, b):
        y = lax.conv_general_dilated(x, w, (1, 1), ((1, 1), (1, 1)),
                                     dimension_numbers=("NCHW", "OIHW", "NCHW"),
                                     precision=lax.Precision.HIGHEST)
        return y + b[None, :, None, None]

    def bn_act(y, g, be):
        m = jnp.mean(y, axis=(0, 2, 3), keepdims=True)
        v = jnp.mean((y - m) ** 2, axis=(0, 2, 3), keepdims=True)
        return jnp.maximum((y - m) * lax.rsqrt(v + BN_EPS)
                           * g[None, :, None, None] + be[None, :, None, None], 0.0)

    y = bn_act(conv(x, p["w1"], p["b1"]), p["g1"], p["be1"])
    y = bn_act(conv(y, p["w2"], p["b2"]), p["g2"], p["be2"])
    return lax.reduce_window(y, -jnp.inf, lax.max,
                             (1, 1, 2, 2), (1, 1, 2, 2), "VALID")


if __name__ == "__main__":
    N, Cin, Cout, H, W = 2, 4, 8, 16, 16
    keys = jax.random.split(jax.random.PRNGKey(0), 10)
    p = {
        "w1": 0.2 * jax.random.normal(keys[1], (Cout, Cin, 3, 3), jnp.float32),
        "b1": 0.1 * jax.random.normal(keys[2], (Cout,), jnp.float32),
        "g1": 1.0 + 0.1 * jax.random.normal(keys[3], (Cout,), jnp.float32),
        "be1": 0.1 * jax.random.normal(keys[4], (Cout,), jnp.float32),
        "w2": 0.2 * jax.random.normal(keys[5], (Cout, Cout, 3, 3), jnp.float32),
        "b2": 0.1 * jax.random.normal(keys[6], (Cout,), jnp.float32),
        "g2": 1.0 + 0.1 * jax.random.normal(keys[7], (Cout,), jnp.float32),
        "be2": 0.1 * jax.random.normal(keys[8], (Cout,), jnp.float32),
    }
    x = jax.random.normal(keys[0], (N, Cin, H, W), jnp.float32)

    out = jax.block_until_ready(downsample_block(x, p))
    ref = jax.block_until_ready(reference(x, p))
    assert out.shape == (N, Cout, H // 2, W // 2), out.shape
    err = float(jnp.max(jnp.abs(out - ref)))
    assert jnp.allclose(out, ref, atol=1e-3, rtol=1e-3), err
    print("KERNEL_OK")
</pallas_src>

<mosaic_0001>
module attributes {stable_mosaic.version = 11 : i64} {
  func.func @kernel(%arg0: memref<48x64xf32, #tpu.memory_space<vmem>>, %arg1: memref<3x64x128xf32, #tpu.memory_space<vmem>>, %arg2: memref<3x128x128xf32, #tpu.memory_space<vmem>>, %arg3: memref<1x128xf32, #tpu.memory_space<vmem>>, %arg4: memref<1x128xf32, #tpu.memory_space<vmem>>, %arg5: memref<1x128xf32, #tpu.memory_space<vmem>>, %arg6: memref<1x128xf32, #tpu.memory_space<vmem>>, %arg7: memref<256x256xf32, #tpu.memory_space<vmem>>, %arg8: memref<16x48xf32, #tpu.memory_space<vmem>>, %arg9: memref<48x128xf32, #tpu.memory_space<vmem>>, %arg10: memref<16x128xf32, #tpu.memory_space<vmem>>) attributes {dimension_semantics = [], scalar_prefetch = 0 : i64, scratch_operands = 0 : i64, tpu.core_type = #tpu.core_type<tc>} {
    %c0 = arith.constant 0 : index
    %c0_0 = arith.constant 0 : index
    %0 = vector.load %arg9[%c0, %c0_0] : memref<48x128xf32, #tpu.memory_space<vmem>>, vector<48x128xf32>
    %c0_1 = arith.constant 0 : index
    %c0_2 = arith.constant 0 : index
    %1 = vector.load %arg0[%c0_1, %c0_2] : memref<48x64xf32, #tpu.memory_space<vmem>>, vector<48x64xf32>
    %c0_3 = arith.constant 0 : index
    %c0_4 = arith.constant 0 : index
    %c0_5 = arith.constant 0 : index
    %2 = vector.load %arg1[%c0_3, %c0_4, %c0_5] : memref<3x64x128xf32, #tpu.memory_space<vmem>>, vector<1x64x128xf32>
    %3 = vector.shape_cast %2 : vector<1x64x128xf32> to vector<64x128xf32>
    %cst = arith.constant dense<0.000000e+00> : vector<48x128xf32>
    %4 = tpu.matmul %1, %3, %cst {dimension_numbers = #tpu.dot_dimension_numbers<[1], [0], [0], [1], [0, 0, 1, 1], [], []>} : vector<48x64xf32>, vector<64x128xf32>, vector<48x128xf32> -> vector<48x128xf32>
    %c1 = arith.constant 1 : index
    %c0_6 = arith.constant 0 : index
    %c0_7 = arith.constant 0 : index
    %5 = vector.load %arg1[%c1, %c0_6, %c0_7] : memref<3x64x128xf32, #tpu.memory_space<vmem>>, vector<1x64x128xf32>
    %6 = vector.shape_cast %5 : vector<1x64x128xf32> to vector<64x128xf32>
    %cst_8 = arith.constant dense<0.000000e+00> : vector<48x128xf32>
    %7 = tpu.matmul %1, %6, %cst_8 {dimension_numbers = #tpu.dot_dimension_numbers<[1], [0], [0], [1], [0, 0, 1, 1], [], []>} : vector<48x64xf32>, vector<64x128xf32>, vector<48x128xf32> -> vector<48x128xf32>
    %c2 = arith.constant 2 : index
    %c0_9 = arith.constant 0 : index
    %c0_10 = arith.constant 0 : index
    %8 = vector.load %arg1[%c2, %c0_9, %c0_10] : memref<3x64x128xf32, #tpu.memory_space<vmem>>, vector<1x64x128xf32>
    %9 = vector.shape_cast %8 : vector<1x64x128xf32> to vector<64x128xf32>
    %cst_11 = arith.constant dense<0.000000e+00> : vector<48x128xf32>
    %10 = tpu.matmul %1, %9, %cst_11 {dimension_numbers = #tpu.dot_dimension_numbers<[1], [0], [0], [1], [0, 0, 1, 1], [], []>} : vector<48x64xf32>, vector<64x128xf32>, vector<48x128xf32> -> vector<48x128xf32>
    %c1_i32 = arith.constant 1 : i32
    %11 = tpu.dynamic_rotate %4 by %c1_i32 dim 0 : vector<48x128xf32>, i32 -> vector<48x128xf32>
    %12 = arith.addf %11, %7 : vector<48x128xf32>
    %c47_i32 = arith.constant 47 : i32
    %13 = tpu.dynamic_rotate %10 by %c47_i32 dim 0 : vector<48x128xf32>, i32 -> vector<48x128xf32>
    %14 = arith.addf %12, %13 : vector<48x128xf32>
    %c0_12 = arith.constant 0 : index
    %c0_13 = arith.constant 0 : index
    %15 = vector.load %arg3[%c0_12, %c0_13] : memref<1x128xf32, #tpu.memory_space<vmem>>, vector<1x128xf32>
    %c0_14 = arith.constant 0 : index
    %c0_15 = arith.constant 0 : index
    %16 = vector.load %arg4[%c0_14, %c0_15] : memref<1x128xf32, #tpu.memory_space<vmem>>, vector<1x128xf32>
    %17 = arith.mulf %14, %0 : vector<48x128xf32>
    %cst_16 = arith.constant dense<0.000000e+00> : vector<128xf32>
    %18 = vector.multi_reduction <add>, %17, %cst_16 [0] : vector<48x128xf32> to vector<128xf32>
    %19 = vector.shape_cast %18 : vector<128xf32> to vector<1x128xf32>
    %20 = arith.mulf %17, %17 : vector<48x128xf32>
    %cst_17 = arith.constant dense<0.000000e+00> : vector<128xf32>
    %21 = vector.multi_reduction <add>, %20, %cst_17 [0] : vector<48x128xf32> to vector<128xf32>
    %22 = vector.shape_cast %21 : vector<128xf32> to vector<1x128xf32>
    %23 = tpu.concatenate %19, %22 in 1 : vector<1x128xf32>, vector<1x128xf32> -> vector<1x256xf32>
    %c0_18 = arith.constant 0 : index
    %c0_19 = arith.constant 0 : index
    %24 = vector.load %arg7[%c0_18, %c0_19] : memref<256x256xf32, #tpu.memory_space<vmem>>, vector<256x256xf32>
    %cst_20 = arith.constant dense<0.000000e+00> : vector<1x256xf32>
    %25 = tpu.matmul %23, %24, %cst_20 {dimension_numbers = #tpu.dot_dimension_numbers<[1], [0], [0], [1], [0, 0, 1, 1], [], []>} : vector<1x256xf32>, vector<256x256xf32>, vector<1x256xf32> -> vector<1x256xf32>
    %cst_21 = arith.constant 0.001953125 : f32
    %26 = vector.broadcast %cst_21 : f32 to vector<1x256xf32>
    %27 = arith.mulf %25, %26 : vector<1x256xf32>
    %28 = vector.extract_strided_slice %27 {offsets = [0, 0], sizes = [1, 128], strides = [1, 1]} : vector<1x256xf32> to vector<1x128xf32>
    %29 = vector.extract_strided_slice %27 {offsets = [0, 128], sizes = [1, 128], strides = [1, 1]} : vector<1x256xf32> to vector<1x128xf32>
    %30 = arith.mulf %28, %28 : vector<1x128xf32>
    %31 = arith.subf %29, %30 : vector<1x128xf32>
    %cst_22 = arith.constant 9.99999974E-6 : f32
    %32 = vector.broadcast %cst_22 : f32 to vector<1x128xf32>
    %33 = arith.addf %31, %32 : vector<1x128xf32>
    %34 = math.rsqrt %33 : vector<1x128xf32>
    %35 = arith.mulf %34, %15 : vector<1x128xf32>
    %36 = vector.broadcast %28 : vector<1x128xf32> to vector<48x128xf32>
    %37 = arith.subf %14, %36 : vector<48x128xf32>
    %38 = vector.broadcast %35 : vector<1x128xf32> to vector<48x128xf32>
    %39 = arith.mulf %37, %38 : vector<48x128xf32>
    %40 = vector.broadcast %16 : vector<1x128xf32> to vector<48x128xf32>
    %41 = arith.addf %39, %40 : vector<48x128xf32>
    %cst_23 = arith.constant 0.000000e+00 : f32
    %42 = vector.broadcast %cst_23 : f32 to vector<48x128xf32>
    %43 = arith.maximumf %41, %42 : vector<48x128xf32>
    %44 = arith.mulf %43, %0 : vector<48x128xf32>
    %c0_24 = arith.constant 0 : index
    %c0_25 = arith.constant 0 : index
    %c0_26 = arith.constant 0 : index
    %45 = vector.load %arg2[%c0_24, %c0_25, %c0_26] : memref<3x128x128xf32, #tpu.memory_space<vmem>>, vector<1x128x128xf32>
    %46 = vector.shape_cast %45 : vector<1x128x128xf32> to vector<128x128xf32>
    %cst_27 = arith.constant dense<0.000000e+00> : vector<48x128xf32>
    %47 = tpu.matmul %44, %46, %cst_27 {dimension_numbers = #tpu.dot_dimension_numbers<[1], [0], [0], [1], [0, 0, 1, 1], [], []>} : vector<48x128xf32>, vector<128x128xf32>, vector<48x128xf32> -> vector<48x128xf32>
    %c1_28 = arith.constant 1 : index
    %c0_29 = arith.constant 0 : index
    %c0_30 = arith.constant 0 : index
    %48 = vector.load %arg2[%c1_28, %c0_29, %c0_30] : memref<3x128x128xf32, #tpu.memory_space<vmem>>, vector<1x128x128xf32>
    %49 = vector.shape_cast %48 : vector<1x128x128xf32> to vector<128x128xf32>
    %cst_31 = arith.constant dense<0.000000e+00> : vector<48x128xf32>
    %50 = tpu.matmul %44, %49, %cst_31 {dimension_numbers = #tpu.dot_dimension_numbers<[1], [0], [0], [1], [0, 0, 1, 1], [], []>} : vector<48x128xf32>, vector<128x128xf32>, vector<48x128xf32> -> vector<48x128xf32>
    %c2_32 = arith.constant 2 : index
    %c0_33 = arith.constant 0 : index
    %c0_34 = arith.constant 0 : index
    %51 = vector.load %arg2[%c2_32, %c0_33, %c0_34] : memref<3x128x128xf32, #tpu.memory_space<vmem>>, vector<1x128x128xf32>
    %52 = vector.shape_cast %51 : vector<1x128x128xf32> to vector<128x128xf32>
    %cst_35 = arith.constant dense<0.000000e+00> : vector<48x128xf32>
    %53 = tpu.matmul %44, %52, %cst_35 {dimension_numbers = #tpu.dot_dimension_numbers<[1], [0], [0], [1], [0, 0, 1, 1], [], []>} : vector<48x128xf32>, vector<128x128xf32>, vector<48x128xf32> -> vector<48x128xf32>
    %c1_i32_36 = arith.constant 1 : i32
    %54 = tpu.dynamic_rotate %47 by %c1_i32_36 dim 0 : vector<48x128xf32>, i32 -> vector<48x128xf32>
    %55 = arith.addf %54, %50 : vector<48x128xf32>
    %c47_i32_37 = arith.constant 47 : i32
    %56 = tpu.dynamic_rotate %53 by %c47_i32_37 dim 0 : vector<48x128xf32>, i32 -> vector<48x128xf32>
    %57 = arith.addf %55, %56 : vector<48x128xf32>
    %c0_38 = arith.constant 0 : index
    %c0_39 = arith.constant 0 : index
    %58 = vector.load %arg5[%c0_38, %c0_39] : memref<1x128xf32, #tpu.memory_space<vmem>>, vector<1x128xf32>
    %c0_40 = arith.constant 0 : index
    %c0_41 = arith.constant 0 : index
    %59 = vector.load %arg6[%c0_40, %c0_41] : memref<1x128xf32, #tpu.memory_space<vmem>>, vector<1x128xf32>
    %60 = arith.mulf %57, %0 : vector<48x128xf32>
    %cst_42 = arith.constant dense<0.000000e+00> : vector<128xf32>
    %61 = vector.multi_reduction <add>, %60, %cst_42 [0] : vector<48x128xf32> to vector<128xf32>
    %62 = vector.shape_cast %61 : vector<128xf32> to vector<1x128xf32>
    %63 = arith.mulf %60, %60 : vector<48x128xf32>
    %cst_43 = arith.constant dense<0.000000e+00> : vector<128xf32>
    %64 = vector.multi_reduction <add>, %63, %cst_43 [0] : vector<48x128xf32> to vector<128xf32>
    %65 = vector.shape_cast %64 : vector<128xf32> to vector<1x128xf32>
    %66 = tpu.concatenate %62, %65 in 1 : vector<1x128xf32>, vector<1x128xf32> -> vector<1x256xf32>
    %c0_44 = arith.constant 0 : index
    %c0_45 = arith.constant 0 : index
    %67 = vector.load %arg7[%c0_44, %c0_45] : memref<256x256xf32, #tpu.memory_space<vmem>>, vector<256x256xf32>
    %cst_46 = arith.constant dense<0.000000e+00> : vector<1x256xf32>
    %68 = tpu.matmul %66, %67, %cst_46 {dimension_numbers = #tpu.dot_dimension_numbers<[1], [0], [0], [1], [0, 0, 1, 1], [], []>} : vector<1x256xf32>, vector<256x256xf32>, vector<1x256xf32> -> vector<1x256xf32>
    %cst_47 = arith.constant 0.001953125 : f32
    %69 = vector.broadcast %cst_47 : f32 to vector<1x256xf32>
    %70 = arith.mulf %68, %69 : vector<1x256xf32>
    %71 = vector.extract_strided_slice %70 {offsets = [0, 0], sizes = [1, 128], strides = [1, 1]} : vector<1x256xf32> to vector<1x128xf32>
    %72 = vector.extract_strided_slice %70 {offsets = [0, 128], sizes = [1, 128], strides = [1, 1]} : vector<1x256xf32> to vector<1x128xf32>
    %73 = arith.mulf %71, %71 : vector<1x128xf32>
    %74 = arith.subf %72, %73 : vector<1x128xf32>
    %cst_48 = arith.constant 9.99999974E-6 : f32
    %75 = vector.broadcast %cst_48 : f32 to vector<1x128xf32>
    %76 = arith.addf %74, %75 : vector<1x128xf32>
    %77 = math.rsqrt %76 : vector<1x128xf32>
    %78 = arith.mulf %77, %58 : vector<1x128xf32>
    %79 = vector.broadcast %71 : vector<1x128xf32> to vector<48x128xf32>
    %80 = arith.subf %57, %79 : vector<48x128xf32>
    %81 = vector.broadcast %78 : vector<1x128xf32> to vector<48x128xf32>
    %82 = arith.mulf %80, %81 : vector<48x128xf32>
    %83 = vector.broadcast %59 : vector<1x128xf32> to vector<48x128xf32>
    %84 = arith.addf %82, %83 : vector<48x128xf32>
    %cst_49 = arith.constant 0.000000e+00 : f32
    %85 = vector.broadcast %cst_49 : f32 to vector<48x128xf32>
    %86 = arith.maximumf %84, %85 : vector<48x128xf32>
    %87 = arith.mulf %86, %0 : vector<48x128xf32>
    %c120_i32 = arith.constant 120 : i32
    %88 = tpu.dynamic_rotate %87 by %c120_i32 dim 1 : vector<48x128xf32>, i32 -> vector<48x128xf32>
    %89 = arith.maximumf %87, %88 : vector<48x128xf32>
    %c47_i32_50 = arith.constant 47 : i32
    %90 = tpu.dynamic_rotate %89 by %c47_i32_50 dim 0 : vector<48x128xf32>, i32 -> vector<48x128xf32>
    %91 = arith.maximumf %89, %90 : vector<48x128xf32>
    %c0_51 = arith.constant 0 : index
    %c0_52 = arith.constant 0 : index
    %92 = vector.load %arg8[%c0_51, %c0_52] : memref<16x48xf32, #tpu.memory_space<vmem>>, vector<16x48xf32>
    %cst_53 = arith.constant dense<0.000000e+00> : vector<16x128xf32>
    %93 = tpu.matmul %92, %91, %cst_53 {dimension_numbers = #tpu.dot_dimension_numbers<[1], [0], [0], [1], [0, 0, 1, 1], [], []>} : vector<16x48xf32>, vector<48x128xf32>, vector<16x128xf32> -> vector<16x128xf32>
    %c0_54 = arith.constant 0 : index
    %c0_55 = arith.constant 0 : index
    %94 = vector.load %arg10[%c0_54, %c0_55] : memref<16x128xf32, #tpu.memory_space<vmem>>, vector<16x128xf32>
    tpu.vector_store %arg10[%c0_54, %c0_55], %93 {strides = array<i32>} : memref<16x128xf32, #tpu.memory_space<vmem>>, vector<16x128xf32>,
    return
  }
}

</mosaic_0001>

<bundles_post_ra>
// kernel: tpu_custom_call.1
= control target key start
LH: loop header
LB: loop body
LE: loop exit
PB: predicated region body
PF: predicated region fallthrough
CT: control target
= control target key end

     0   :  { %15 = vsyncpa [#allocation3], 0  ;;  %s2658_s0 = inlined_call_operand.hbm [shape: f32[48,64], index: 0, kind: input, shape index: {}]   ;;  %s2659_s1 = inlined_call_operand.hbm [shape: f32[3,64,128], index: 1, kind: input, shape index: {}]   ;;  %s2660_s2 = inlined_call_operand.hbm [shape: f32[3,128,128], index: 2, kind: input, shape index: {}]   ;;  %s2661_s3 = inlined_call_operand.vmem [shape: f32[1,128], index: 3, kind: input, shape index: {}]   ;;  %s2662_s4 = inlined_call_operand.vmem [shape: f32[1,128], index: 4, kind: input, shape index: {}]   ;;  %s2663_s5 = inlined_call_operand.vmem [shape: f32[1,128], index: 5, kind: input, shape index: {}]   ;;  %s2664_s6 = inlined_call_operand.vmem [shape: f32[1,128], index: 6, kind: input, shape index: {}]   ;;  %s2665_s7 = inlined_call_operand.hbm [shape: f32[256,256], index: 7, kind: input, shape index: {}]   ;;  %s2666_s8 = inlined_call_operand.vmem [shape: f32[16,48], index: 8, kind: input, shape index: {}]   ;;  %s2667_s9 = inlined_call_operand.hbm [shape: f32[48,128], index: 9, kind: input, shape index: {}]   ;;  %s2668_s10 = inlined_call_operand.hbm [shape: f32[16,128], index: 10, kind: output, shape index: {}]  }
   0x1   :  { %16 = vsyncpa [#allocation6], 0 }
   0x2   :  { %17 = vsyncpa [#allocation9], 0 }
   0x3   :  { %18 = vsyncpa [#allocation4], 0  ;;  %s2178_s13 = smov [#allocation5]   ;;  %s2179_s15 = smov [#allocation8]  }
   0x4   :  { %s36_s14 = sshll.u32 %s2178_s13, 4  ;;  %s68_s16 = sshll.u32 %s2179_s15, 4  ;;  %s37_s14 = int_to_ptr.vmem [resolvable:$true] %s36_s14  ;;  %s2244_s16 = int_to_ptr.vmem [resolvable:$true] %s68_s16 }
   0x5   :  { %s2038_s19 = scalar_lea.hbm %s2659_s1, 3072 }
   0x6   :  { %p2039_p0 = scmp.ne.s32.totalorder %s2659_s1, %s2038_s19  ;;  %p2042_p1 = scmp.lt.u32.totalorder %s2038_s19, %s2659_s1 }
   0x8   :  { %p2044_p2 = pnand %p2042_p1, %p2039_p0 }
   0xa   :  { %2047 = shalt.err (!%p2044_p2)
}
   0xb   :  { %s2048_s24 = scalar_lea.vmem %s37_s14, 3072  ;;  %p2053_p4 = scmp.lt.s32.totalorder %s37_s14, %s37_s14 }
   0xc   :  { %p2049_p3 = scmp.ne.s32.totalorder %s37_s14, %s2048_s24  ;;  %p2054_p5 = scmp.lt.s32.totalorder %s2048_s24, %s2048_s24 }
   0xe   :  { %p2055_p6 = por %p2054_p5, %p2053_p4 }
  0x10   :  { %p2056_p7 = pnand %p2055_p6, %p2049_p3 }
  0x12   :  { %2059 = shalt.err (!%p2056_p7)
}
  0x13   :  { %s2180_s25 = smov 128   ;;  %s2181_s26 = smov 8  }
  0x14   :  { %42 = dma.hbm_to_vmem [thread:$0]  %s2659_s1, 3072, %s37_s14, [#allocation6], %s2180_s25, %s2180_s25, %s2181_s26  }
  0x15   :  { %s2060_s11 = scalar_lea.hbm %s2665_s7, 8192 }
  0x16   :  { %p2061_p8 = scmp.ne.s32.totalorder %s2665_s7, %s2060_s11  ;;  %p2064_p9 = scmp.lt.u32.totalorder %s2060_s11, %s2665_s7 }
  0x18   :  { %p2066_p10 = pnand %p2064_p9, %p2061_p8 }
  0x1a   :  { %2069 = shalt.err (!%p2066_p10)
}
  0x1b   :  { %s2070_s18 = scalar_lea.vmem %s2244_s16, 8192  ;;  %p2075_p12 = scmp.lt.s32.totalorder %s2244_s16, %s2244_s16 }
  0x1c   :  { %p2071_p11 = scmp.ne.s32.totalorder %s2244_s16, %s2070_s18  ;;  %p2076_p13 = scmp.lt.s32.totalorder %s2070_s18, %s2070_s18 }
  0x1e   :  { %p2077_p0 = por %p2076_p13, %p2075_p12 }
  0x20   :  { %p2078_p1 = pnand %p2077_p0, %p2071_p11 }
  0x22   :  { %2081 = shalt.err (!%p2078_p1)
}
  0x23   :  { %s2182_s1 = smov 256   ;;  %s2183_s14 = smov 16  }
  0x24   :  { %74 = dma.hbm_to_vmem [thread:$0]  %s2665_s7, 8192, %s2244_s16, [#allocation9], %s2182_s1, %s2182_s1, %s2183_s14  }
  0x25   :  { %s2184_s21 = smov [#allocation2]   ;;  %s2185_s23 = smov [#allocation7]  }
  0x26   :  { %s24_s22 = sshll.u32 %s2184_s21, 4  ;;  %s48_s24 = sshll.u32 %s2185_s23, 4  ;;  %s25_s22 = int_to_ptr.vmem [resolvable:$true] %s24_s22  ;;  %s2278_s24 = int_to_ptr.vmem [resolvable:$true] %s48_s24 }
  0x27   :  { %s2082_s29 = scalar_lea.hbm %s2658_s0, 768 }
  0x28   :  { %p2083_p2 = scmp.ne.s32.totalorder %s2658_s0, %s2082_s29  ;;  %p2086_p3 = scmp.lt.u32.totalorder %s2082_s29, %s2658_s0 }
  0x2a   :  { %p2088_p4 = pnand %p2086_p3, %p2083_p2 }
  0x2c   :  { %2091 = shalt.err (!%p2088_p4)
}
  0x2d   :  { %s2092_s7 = scalar_lea.vmem %s25_s22, 768  ;;  %p2097_p6 = scmp.lt.s32.totalorder %s25_s22, %s25_s22 }
  0x2e   :  { %p2093_p5 = scmp.ne.s32.totalorder %s25_s22, %s2092_s7  ;;  %p2098_p7 = scmp.lt.s32.totalorder %s2092_s7, %s2092_s7 }
  0x30   :  { %p2099_p8 = por %p2098_p7, %p2097_p6 }
  0x32   :  { %p2100_p9 = pnand %p2099_p8, %p2093_p5 }
  0x34   :  { %2103 = shalt.err (!%p2100_p9)
}
  0x35   :  { %30 = dma.hbm_to_vmem [thread:$0]  %s2658_s0, 768, %s25_s22, [#allocation3], %s2180_s25, %s2180_s25, %s2181_s26  }
  0x36   :  { %s2104_s1 = scalar_lea.hbm %s2660_s2, 6144 }
  0x37   :  { %p2105_p10 = scmp.ne.s32.totalorder %s2660_s2, %s2104_s1  ;;  %p2108_p11 = scmp.lt.u32.totalorder %s2104_s1, %s2660_s2 }
  0x39   :  { %p2110_p12 = pnand %p2108_p11, %p2105_p10 }
  0x3b   :  { %2113 = shalt.err (!%p2110_p12)
}
  0x3c   :  { %s2114_s23 = scalar_lea.vmem %s2278_s24, 6144  ;;  %p2119_p0 = scmp.lt.s32.totalorder %s2278_s24, %s2278_s24 }
  0x3d   :  { %p2115_p13 = scmp.ne.s32.totalorder %s2278_s24, %s2114_s23  ;;  %p2120_p1 = scmp.lt.s32.totalorder %s2114_s23, %s2114_s23 }
  0x3f   :  { %p2121_p2 = por %p2120_p1, %p2119_p0 }
  0x41   :  { %p2122_p3 = pnand %p2121_p2, %p2115_p13 }
  0x43   :  { %2125 = shalt.err (!%p2122_p3)
}
  0x44   :  { %54 = dma.hbm_to_vmem [thread:$0]  %s2660_s2, 6144, %s2278_s24, [#allocation6], %s2180_s25, %s2180_s25, %s2181_s26  }
  0x45   :  { %s2186_s27 = smov [#allocation10]   ;;  %s2126_s11 = scalar_lea.hbm %s2667_s9, 768 }
  0x46   :  { %s82_s28 = sshll.u32 %s2186_s27, 4  ;;  %p2127_p4 = scmp.ne.s32.totalorder %s2667_s9, %s2126_s11  ;;  %s83_s28 = int_to_ptr.vmem [resolvable:$true] %s82_s28 }
  0x47   :  { %p2130_p5 = scmp.lt.u32.totalorder %s2126_s11, %s2667_s9 }
  0x49   :  { %p2132_p6 = pnand %p2130_p5, %p2127_p4 }
  0x4b   :  { %2135 = shalt.err (!%p2132_p6)
}
  0x4c   :  { %s2136_s15 = scalar_lea.vmem %s83_s28, 768  ;;  %p2141_p8 = scmp.lt.s32.totalorder %s83_s28, %s83_s28 }
  0x4d   :  { %p2137_p7 = scmp.ne.s32.totalorder %s83_s28, %s2136_s15  ;;  %p2142_p9 = scmp.lt.s32.totalorder %s2136_s15, %s2136_s15 }
  0x4f   :  { %p2143_p10 = por %p2142_p9, %p2141_p8 }
  0x51   :  { %p2144_p11 = pnand %p2143_p10, %p2137_p7 }
  0x53   :  { %2147 = shalt.err (!%p2144_p11)
}
  0x54   :  { %88 = dma.hbm_to_vmem [thread:$0]  %s2667_s9, 768, %s83_s28, [#allocation9], %s2180_s25, %s2180_s25, %s2181_s26  }
  0x55   :  { %2170 = dma.done.wait [#allocation3], 768  }
  0x56   :  { %2171 = vsyncadd [#allocation3], 4294966528 }
  0x57   :  { %2172 = dma.done.wait [#allocation6], 9216  }
  0x58   :  { %2173 = vsyncadd [#allocation6], 4294958080 }
  0x59   :  { %2174 = dma.done.wait [#allocation9], 8960  }
  0x5a   :  { %2175 = vsyncadd [#allocation9], 4294958336  ;;  %v116_v0 = vld [vmem:[#allocation5] sm:$0xff]  ;;  %v117_v1 = vld [vmem:[#allocation5 + $0x8] sm:$0xff]  ;;  %vm124_vm0 = vcmask 523264   ;;  %vm1275_vm3 = vcmask 392192  }
  0x5b   :  { %v118_v2 = vld [vmem:[#allocation5 + $0x10] sm:$0xff]  ;;  %v1729_v3 = vpack.c.bf16 %v117_v1, %v116_v0  ;;  %v119_v4 = vld [vmem:[#allocation5 + $0x18] sm:$0xff]  ;;  %v343_v5 = vld [vmem:[#allocation5 + $0x80] sm:$0xff]  ;;  %s2188_s0 = smov [#allocation11]  }
  0x5c   :  { %v344_v6 = vld [vmem:[#allocation5 + $0x88] sm:$0xff]  ;;  %v1733_v7 = vpack.c.bf16 %v119_v4, %v118_v2  ;;  %v120_v9 = vld [vmem:[#allocation5 + $0x20] sm:$0xff]  ;;  %v345_v11 = vld [vmem:[#allocation5 + $0x90] sm:$0xff]  ;;  %s1364_s22 = sshll.u32 %s2188_s0, 4  ;;  %s1365_s22 = int_to_ptr.vmem [resolvable:$true] %s1364_s22 }
  0x5d   :  { %v1761_v8 = vpack.c.bf16 %v344_v6, %v343_v5  ;;  %v121_v10 = vld [vmem:[#allocation5 + $0x28] sm:$0xff]  ;;  %1730 = vmatprep.subr.bf16.mxu1 %v1729_v3  ;;  %v346_v12 = vld [vmem:[#allocation5 + $0x98] sm:$0xff]  ;;  %v347_v14 = vld [vmem:[#allocation5 + $0xa0] sm:$0xff]  ;;  %s2148_s27 = scalar_lea.vmem %s1365_s22, 256  ;;  %p2153_p13 = scmp.lt.s32.totalorder %s1365_s22, %s1365_s22 }
  0x5e   :  { %1732 = vmatpush3.bf16.msra.mxu1 %v1729_v3  ;;  %v1765_v13 = vpack.c.bf16 %v346_v12, %v345_v11  ;;  %v348_v15 = vld [vmem:[#allocation5 + $0xa8] sm:$0xff]  ;;  %v110_v16 = vld [vmem:[#allocation2] sm:$0xff]  ;;  %v1737_v17 = vpack.c.bf16 %v121_v10, %v120_v9  ;;  %v123_v19 = vld [vmem:[#allocation5 + $0x38] sm:$0xff]  ;;  %p2149_p12 = scmp.ne.s32.totalorder %s1365_s22, %s2148_s27  ;;  %p2154_p0 = scmp.lt.s32.totalorder %s2148_s27, %s2148_s27 }
  0x5f   :  { %1762 = vmatprep.subr.bf16.mxu0 %v1761_v8  ;;  %1734 = vmatprep.subr.bf16.mxu1 %v1733_v7  ;;  %v122_v18 = vld [vmem:[#allocation5 + $0x30] sm:$0xff]  ;;  %v1769_v20 = vpack.c.bf16 %v348_v15, %v347_v14  ;;  %v350_v22 = vld [vmem:[#allocation5 + $0xb8] sm:$0xff]  ;;  %v239_v24 = vld [vmem:[#allocation5 + $0x40] sm:$0xff] }
  0x60   :  { %1764 = vmatpush3.bf16.msra.mxu0 %v1761_v8  ;;  %1532 = vmatprep.mubr.msk.f32.mxu1 %vm124_vm0, %v110_v16  ;;  %v349_v21 = vld [vmem:[#allocation5 + $0xb0] sm:$0xff]  ;;  %v1741_v23 = vpack.c.bf16 %v123_v19, %v122_v18  ;;  %v240_v25 = vld [vmem:[#allocation5 + $0x48] sm:$0xff]  ;;  %v242_v29 = vld [vmem:[#allocation5 + $0x58] sm:$0xff]  ;;  %p2155_p1 = por %p2154_p0, %p2153_p13 }
  0x61   :  { %1766 = vmatprep.subr.bf16.mxu0 %v1765_v13  ;;  %1582 = vmatprep.mubr.msk.f32.mxu0 %vm124_vm0, %v110_v16  ;;  %v1773_v26 = vpack.c.bf16 %v350_v22, %v349_v21  ;;  %v1745_v27 = vpack.c.bf16 %v240_v25, %v239_v24  ;;  %v241_v28 = vld [vmem:[#allocation5 + $0x50] sm:$0xff]  ;;  %v111_v30 = vld [vmem:[#allocation2 + $0x8] sm:$0xff]  ;;  %v112_v31 = vld [vmem:[#allocation2 + $0x10] sm:$0xff] }
  0x62   :  { %1736 = vmatpush3.bf16.msra.mxu1 %v1733_v7  ;;  %v1749_v32 = vpack.c.bf16 %v242_v29, %v241_v28  ;;  %v243_v33 = vld [vmem:[#allocation5 + $0x60] sm:$0xff]  ;;  %v244_v34 = vld [vmem:[#allocation5 + $0x68] sm:$0xff]  ;;  %v114_v36 = vld [vmem:[#allocation2 + $0x20] sm:$0xff]  ;;  %p2156_p2 = pnand %p2155_p1, %p2149_p12 }
  0x63   :  { %1738 = vmatprep.subr.bf16.mxu1 %v1737_v17  ;;  %v113_v35 = vld [vmem:[#allocation2 + $0x18] sm:$0xff]  ;;  %v1753_v37 = vpack.c.bf16 %v244_v34, %v243_v33  ;;  %v245_v38 = vld [vmem:[#allocation5 + $0x70] sm:$0xff]  ;;  %v246_v39 = vld [vmem:[#allocation5 + $0x78] sm:$0xff] }
  0x64   :  { %1768 = vmatpush3.bf16.msra.mxu0 %v1765_v13  ;;  %v115_v40 = vld [vmem:[#allocation2 + $0x28] sm:$0xff]  ;;  %v1757_v41 = vpack.c.bf16 %v246_v39, %v245_v38  ;;  %v523_v42 = vld [vmem:[#allocation8 + $0x8] sm:$0xff]  ;;  %v522_v45 = vld [vmem:[#allocation8] sm:$0xff] }
  0x65   :  { %1770 = vmatprep.subr.bf16.mxu0 %v1769_v20  ;;  %v525_v43 = vld [vmem:[#allocation8 + $0x18] sm:$0xff]  ;;  %v524_v46 = vld [vmem:[#allocation8 + $0x10] sm:$0xff]  ;;  %v527_v47 = vld [vmem:[#allocation8 + $0x28] sm:$0xff] }
  0x66   :  { %1740 = vmatpush3.bf16.msra.mxu1 %v1737_v17  ;;  %v2343_v44 = vpack.c.bf16 %v525_v43, %v523_v42  ;;  %v529_v48 = vld [vmem:[#allocation8 + $0x38] sm:$0xff]  ;;  %v2345_v49 = vpack.c.bf16 %v524_v46, %v522_v45  ;;  %v526_v51 = vld [vmem:[#allocation8 + $0x20] sm:$0xff]  ;;  %v528_v52 = vld [vmem:[#allocation8 + $0x30] sm:$0xff] }
  0x67   :  { %1742 = vmatprep.subr.bf16.mxu1 %v1741_v23  ;;  %v2348_v50 = vpack.c.bf16 %v529_v48, %v527_v47  ;;  %v531_v53 = vld [vmem:[#allocation8 + $0x48] sm:$0xff]  ;;  %v533_v54 = vld [vmem:[#allocation8 + $0x58] sm:$0xff]  ;;  %v2353_v55 = vpack.c.bf16 %v528_v52, %v526_v51  ;;  %v530_v57 = vld [vmem:[#allocation8 + $0x40] sm:$0xff] }
  0x68   :  { %1772 = vmatpush3.bf16.msra.mxu0 %v1769_v20  ;;  %v2356_v56 = vpack.c.bf16 %v533_v54, %v531_v53  ;;  %v532_v58 = vld [vmem:[#allocation8 + $0x50] sm:$0xff]  ;;  %v535_v59 = vld [vmem:[#allocation8 + $0x68] sm:$0xff]  ;;  %v537_v60 = vld [vmem:[#allocation8 + $0x78] sm:$0xff] }
  0x69   :  { %1774 = vmatprep.subr.bf16.mxu0 %v1773_v26  ;;  %v2361_v61 = vpack.c.bf16 %v532_v58, %v530_v57  ;;  %v2364_v62 = vpack.c.bf16 %v537_v60, %v535_v59  ;;  %v534_v63 = vld [vmem:[#allocation8 + $0x60] sm:$0xff]  ;;  %v536_v0 = vld [vmem:[#allocation8 + $0x70] sm:$0xff]  ;;  %v539_v2 = vld [vmem:[#allocation8 + $0x88] sm:$0xff] }
  0x6a   :  { %1744 = vmatpush3.bf16.msra.mxu1 %v1741_v23  ;;  %v2369_v1 = vpack.c.bf16 %v536_v0, %v534_v63  ;;  %v541_v3 = vld [vmem:[#allocation8 + $0x98] sm:$0xff]  ;;  %v538_v5 = vld [vmem:[#allocation8 + $0x80] sm:$0xff]  ;;  %v540_v6 = vld [vmem:[#allocation8 + $0x90] sm:$0xff] }
  0x6b   :  { %1746 = vmatprep.subr.bf16.mxu1 %v1745_v27  ;;  %v2372_v4 = vpack.c.bf16 %v541_v3, %v539_v2  ;;  %v2374_v7 = vpack.c.bf16 %v540_v6, %v538_v5  ;;  %v543_v8 = vld [vmem:[#allocation8 + $0xa8] sm:$0xff]  ;;  %v545_v9 = vld [vmem:[#allocation8 + $0xb8] sm:$0xff]  ;;  %v542_v11 = vld [vmem:[#allocation8 + $0xa0] sm:$0xff] }
  0x6c   :  { %1776 = vmatpush3.bf16.msra.mxu0 %v1773_v26  ;;  %v2378_v10 = vpack.c.bf16 %v545_v9, %v543_v8  ;;  %v544_v12 = vld [vmem:[#allocation8 + $0xb0] sm:$0xff]  ;;  %v547_v14 = vld [vmem:[#allocation8 + $0xc8] sm:$0xff]  ;;  %v549_v15 = vld [vmem:[#allocation8 + $0xd8] sm:$0xff] }
  0x6d   :  { %1533 = vmatmul.mubr.msk.f32.vlgmr.msra.gmra.mrb[0].mxu1 %vm124_vm0, %v111_v30  ;;  %v2380_v13 = vpack.c.bf16 %v544_v12, %v542_v11  ;;  %v546_v17 = vld [vmem:[#allocation8 + $0xc0] sm:$0xff]  ;;  %v548_v18 = vld [vmem:[#allocation8 + $0xd0] sm:$0xff]  ;;  %v551_v20 = vld [vmem:[#allocation8 + $0xe8] sm:$0xff] }
  0x6e   :  { %1748 = vmatpush3.bf16.msra.mxu1 %v1745_v27  ;;  %1535 = vmatprep.mubr.msk.f32.mxu1 %vm124_vm0, %v112_v31  ;;  %v2386_v19 = vpack.c.bf16 %v548_v18, %v546_v17  ;;  %v553_v21 = vld [vmem:[#allocation8 + $0xf8] sm:$0xff]  ;;  %v550_v23 = vld [vmem:[#allocation8 + $0xe0] sm:$0xff]  ;;  %v552_v24 = vld [vmem:[#allocation8 + $0xf0] sm:$0xff] }
  0x6f   :  { %1750 = vmatprep.subr.bf16.mxu1 %v1749_v32  ;;  %1583 = vmatmul.mubr.msk.f32.vlgmr.msra.gmra.mrb[0].mxu0 %vm124_vm0, %v111_v30  ;;  %v2390_v22 = vpack.c.bf16 %v553_v21, %v551_v20  ;;  %v2393_v25 = vpack.c.bf16 %v552_v24, %v550_v23  ;;  %v555_v26 = vld [vmem:[#allocation8 + $0x108] sm:$0xff]  ;;  %v557_v27 = vld [vmem:[#allocation8 + $0x118] sm:$0xff]  ;;  %v554_v29 = vld [vmem:[#allocation8 + $0x100] sm:$0xff] }
  0x70   :  { %1585 = vmatprep.mubr.msk.f32.mxu0 %vm124_vm0, %v112_v31  ;;  %v2396_v28 = vpack.c.bf16 %v557_v27, %v555_v26  ;;  %v561_v33 = vld [vmem:[#allocation8 + $0x138] sm:$0xff]  ;;  %v563_v38 = vld [vmem:[#allocation8 + $0x148] sm:$0xff]  ;;  %v564_v42 = vld [vmem:[#allocation8 + $0x150] sm:$0xff]  ;;  %v452_v26 = vlaneseq }
  0x71   :  { %1536 = vmatmul.mubr.msk.f32.gmra.mrb[2].mxu1 %vm124_vm0, %v113_v35  ;;  %v565_v39 = vld [vmem:[#allocation8 + $0x158] sm:$0xff]  ;;  %v567_v45 = vld [vmem:[#allocation8 + $0x168] sm:$0xff]  ;;  %v566_v48 = vld [vmem:[#allocation8 + $0x160] sm:$0xff] }
  0x72   :  { %1752 = vmatpush3.bf16.msra.mxu1 %v1749_v32  ;;  %1538 = vmatprep.mubr.msk.f32.mxu1 %vm124_vm0, %v114_v36  ;;  %v559_v32 = vld [vmem:[#allocation8 + $0x128] sm:$0xff]  ;;  %v569_v46 = vld [vmem:[#allocation8 + $0x178] sm:$0xff]  ;;  %v568_v51 = vld [vmem:[#allocation8 + $0x170] sm:$0xff]  ;;  %v2444_v27 = vshrl.u32 %v452_v26, 7 }
  0x73   :  { %1754 = vmatprep.subr.bf16.mxu1 %v1753_v37  ;;  %1586 = vmatmul.mubr.msk.f32.gmra.mrb[2].mxu0 %vm124_vm0, %v113_v35  ;;  %v2402_v34 = vpack.c.bf16 %v561_v33, %v559_v32  ;;  %v2414_v47 = vpack.c.bf16 %v569_v46, %v567_v45  ;;  %v2416_v52 = vpack.c.bf16 %v568_v51, %v566_v48  ;;  %v571_v53 = vld [vmem:[#allocation8 + $0x188] sm:$0xff]  ;;  %v573_v54 = vld [vmem:[#allocation8 + $0x198] sm:$0xff]  ;;  %v570_v58 = vld [vmem:[#allocation8 + $0x180] sm:$0xff] }
  0x74   :  { %1588 = vmatprep.mubr.msk.f32.mxu0 %vm124_vm0, %v114_v36  ;;  %v2420_v57 = vpack.c.bf16 %v573_v54, %v571_v53  ;;  %v572_v59 = vld [vmem:[#allocation8 + $0x190] sm:$0xff]  ;;  %v575_v63 = vld [vmem:[#allocation8 + $0x1a8] sm:$0xff]  ;;  %v577_v0 = vld [vmem:[#allocation8 + $0x1b8] sm:$0xff]  ;;  %vm454_vm1 = vcmp.lt.s32.totalorder %v2444_v27, 1  ;;  %vm473_vm2 = vcmp.lt.s32.totalorder %v2444_v27, 7 }
  0x75   :  { %1539 = vmatmul.mubr.msk.f32.gmra.mrb[4].mxu1 %vm124_vm0, %v115_v40  ;;  %v2422_v60 = vpack.c.bf16 %v572_v59, %v570_v58  ;;  %v2426_v2 = vpack.c.bf16 %v577_v0, %v575_v63  ;;  %v574_v3 = vld [vmem:[#allocation8 + $0x1a0] sm:$0xff]  ;;  %v576_v5 = vld [vmem:[#allocation8 + $0x1b0] sm:$0xff]  ;;  %v579_v8 = vld [vmem:[#allocation8 + $0x1c8] sm:$0xff] }
  0x76   :  { %1756 = vmatpush3.bf16.msra.mxu1 %v1753_v37  ;;  %1557 = vmatprep.mubr.msk.f32.mxu1 %vm124_vm0, %v110_v16  ;;  %v2384_v16 = vpack.c.bf16 %v549_v15, %v547_v14  ;;  %v2428_v6 = vpack.c.bf16 %v576_v5, %v574_v3  ;;  %v581_v9 = vld [vmem:[#allocation8 + $0x1d8] sm:$0xff]  ;;  %v578_v12 = vld [vmem:[#allocation8 + $0x1c0] sm:$0xff]  ;;  %v580_v14 = vld [vmem:[#allocation8 + $0x1d0] sm:$0xff] }
  0x77   :  { %1758 = vmatprep.subr.bf16.mxu1 %v1757_v41  ;;  %1589 = vmatmul.mubr.msk.f32.gmra.mrb[4].mxu0 %vm124_vm0, %v115_v40  ;;  %2676 = vst [vmem:[#allocation16_spill] sm:$0xff] %v2422_v60  ;;  %2677 = vst [vmem:[#allocation17_spill] sm:$0xff] %v2426_v2  ;;  %v2432_v11 = vpack.c.bf16 %v581_v9, %v579_v8  ;;  %v2434_v15 = vpack.c.bf16 %v580_v14, %v578_v12  ;;  %v583_v17 = vld [vmem:[#allocation8 + $0x1e8] sm:$0xff]  ;;  %v585_v18 = vld [vmem:[#allocation8 + $0x1f8] sm:$0xff] }
  0x78   :  { %2678 = vst [vmem:[#allocation18_spill] sm:$0xff] %v2428_v6  ;;  %v582_v20 = vld [vmem:[#allocation8 + $0x1e0] sm:$0xff]  ;;  %v2437_v21 = vpack.c.bf16 %v585_v18, %v583_v17  ;;  %v584_v23 = vld [vmem:[#allocation8 + $0x1f0] sm:$0xff] }
  0x79   :  { %2679 = vst [vmem:[#allocation19_spill] sm:$0xff] %v2432_v11  ;;  %2680 = vst [vmem:[#allocation20_spill] sm:$0xff] %v2434_v15  ;;  %v2440_v24 = vpack.c.bf16 %v584_v23, %v582_v20 }
  0x7a   :  { %1760 = vmatpush3.bf16.msra.mxu1 %v1757_v41  ;;  %v562_v41 = vld [vmem:[#allocation8 + $0x140] sm:$0xff]  ;;  %2681 = vst [vmem:[#allocation21_spill] sm:$0xff] %v2437_v21 }
  0x7b   :  { %1778 = vmatprep.subr.bf16.mxu1 %v2343_v44  ;;  %v2410_v43 = vpack.c.bf16 %v564_v42, %v562_v41  ;;  %2682 = vst [vmem:[#allocation22_spill] sm:$0xff] %v2440_v24 }
  0x7d   :  { %1558 = vmatmul.mubr.msk.f32.vlgmr.msra.gmra.mrb[6].mxu1 %vm124_vm0, %v111_v30  ;;  %v556_v30 = vld [vmem:[#allocation8 + $0x110] sm:$0xff] }
  0x7e   :  { %1560 = vmatprep.mubr.msk.f32.mxu1 %vm124_vm0, %v112_v31  ;;  %1780 = vmatpush1.bf16.msra.mxu1 %v2345_v49  ;;  %v2398_v31 = vpack.c.bf16 %v556_v30, %v554_v29 }
  0x7f   :  { %1782 = vmatprep.subr.bf16.mxu1 %v2348_v50 }
  0x81   :  { %1561 = vmatmul.mubr.msk.f32.gmra.mrb[8].mxu1 %vm124_vm0, %v113_v35  ;;  %v558_v35 = vld [vmem:[#allocation8 + $0x120] sm:$0xff] }
  0x82   :  { %1563 = vmatprep.mubr.msk.f32.mxu1 %vm124_vm0, %v114_v36  ;;  %1784 = vmatpush1.bf16.msra.mxu1 %v2353_v55  ;;  %v560_v36 = vld [vmem:[#allocation8 + $0x130] sm:$0xff] }
  0x83   :  { %1786 = vmatprep.subr.bf16.mxu1 %v2356_v56  ;;  %v2404_v37 = vpack.c.bf16 %v560_v36, %v558_v35 }
  0x85   :  { %1564 = vmatmul.mubr.msk.f32.gmra.mrb[10].mxu1 %vm124_vm0, %v115_v40  ;;  %v2408_v40 = vpack.c.bf16 %v565_v39, %v563_v38 }
  0x86   :  { %1788 = vmatpush1.bf16.msra.mxu1 %v2361_v61 }
  0x87   :  { %1790 = vmatprep.subr.bf16.mxu1 %v2364_v62 }
  0x8a   :  { %1792 = vmatpush1.bf16.msra.mxu1 %v2369_v1 }
  0x8b   :  { %1794 = vmatprep.subr.bf16.mxu1 %v2372_v4 }
  0x8e   :  { %1796 = vmatpush1.bf16.msra.mxu1 %v2374_v7 }
  0x8f   :  { %1798 = vmatprep.subr.bf16.mxu1 %v2378_v10 }
  0x92   :  { %1800 = vmatpush1.bf16.msra.mxu1 %v2380_v13 }
  0x93   :  { %1802 = vmatprep.subr.bf16.mxu1 %v2384_v16 }
  0x96   :  { %1804 = vmatpush1.bf16.msra.mxu1 %v2386_v19 }
  0x97   :  { %1806 = vmatprep.subr.bf16.mxu1 %v2390_v22 }
  0x9a   :  { %1808 = vmatpush1.bf16.msra.mxu1 %v2393_v25 }
  0x9b   :  { %1810 = vmatprep.subr.bf16.mxu1 %v2396_v28 }
  0x9e   :  { %1812 = vmatpush1.bf16.msra.mxu1 %v2398_v31 }
  0x9f   :  { %1814 = vmatprep.subr.bf16.mxu1 %v2402_v34 }
  0xa2   :  { %1816 = vmatpush1.bf16.msra.mxu1 %v2404_v37 }
  0xa3   :  { %1818 = vmatprep.subr.bf16.mxu1 %v2408_v40 }
  0xa6   :  { %1820 = vmatpush1.bf16.msra.mxu1 %v2410_v43 }
  0xa7   :  { %1822 = vmatprep.subr.bf16.mxu1 %v2414_v47 }
  0xaa   :  { %1824 = vmatpush1.bf16.msra.mxu1 %v2416_v52 }
  0xab   :  { %1826 = vmatprep.subr.bf16.mxu1 %v2420_v57 }
  0xae   :  { %1828 = vmatpush1.bf16.msra.mxu1 %v2422_v60 }
  0xaf   :  { %1830 = vmatprep.subr.bf16.mxu1 %v2426_v2 }
  0xb2   :  { %1832 = vmatpush1.bf16.msra.mxu1 %v2428_v6 }
  0xb3   :  { %1834 = vmatprep.subr.bf16.mxu1 %v2432_v11 }
  0xb6   :  { %1836 = vmatpush1.bf16.msra.mxu1 %v2434_v15 }
  0xb7   :  { %1838 = vmatprep.subr.bf16.mxu1 %v2437_v21 }
  0xba   :  { %1840 = vmatpush1.bf16.msra.mxu1 %v2440_v24 }
 0x140   :  { %v1534_v29 = vpop.f32.mrb[0].mxu1 }
 0x141   :  { %v447_v30 = vrot.slane %v1534_v29, 7  ;;  %v209_v32 = vpop.f32.mrb[1].mxu1 }
 0x142   :  { %v446_v33 = vrot.slane %v209_v32, 7  ;;  %v1584_v35 = vpop.f32.mrb[0].mxu0 }
 0x143   :  { %v468_v36 = vrot.slane %v1584_v35, 1  ;;  %v417_v38 = vpop.f32.mrb[1].mxu0 }
 0x144   :  { %v1537_v39 = vpop.f32.mrb[2].mxu1  ;;  %v467_v41 = vrot.slane %v417_v38, 1  ;;  %v459_v42 = vsel %vm454_vm1, %v446_v33, %v447_v30 }
 0x145   :  { %v449_v45 = vrot.slane %v1537_v39, 7  ;;  %v219_v46 = vpop.f32.mrb[3].mxu1 }
 0x146   :  { %v448_v48 = vrot.slane %v219_v46, 7  ;;  %v1587_v51 = vpop.f32.mrb[2].mxu0  ;;  %v478_v53 = vsel %vm473_vm2, %v467_v41, %v468_v36  ;;  %v2472_v46 = vld [vmem:[#allocation10 + $0x8] sm:$0xff] }
 0x147   :  { %v470_v54 = vrot.slane %v1587_v51, 1  ;;  %v427_v58 = vpop.f32.mrb[3].mxu0 }
 0x148   :  { %v1540_v59 = vpop.f32.mrb[4].mxu1  ;;  %v469_v63 = vrot.slane %v427_v58, 1  ;;  %v457_v0 = vsel %vm454_vm1, %v448_v48, %v449_v45  ;;  %v458_v3 = vsel %vm454_vm1, %v447_v30, %v448_v48  ;;  %v2476_v58 = vld [vmem:[#allocation10] sm:$0xff] }
 0x149   :  { %v451_v5 = vrot.slane %v1540_v59, 7  ;;  %v229_v8 = vpop.f32.mrb[5].mxu1 }
 0x14a   :  { %v450_v9 = vrot.slane %v229_v8, 7  ;;  %v1590_v12 = vpop.f32.mrb[4].mxu0  ;;  %v477_v14 = vsel %vm473_vm2, %v468_v36, %v469_v63  ;;  %v476_v17 = vsel %vm473_vm2, %v469_v63, %v470_v54 }
 0x14b   :  { %v472_v18 = vrot.slane %v1590_v12, 1  ;;  %v460_v20 = vsel %vm454_vm1, %v451_v5, %v446_v33  ;;  %v437_v23 = vpop.f32.mrb[5].mxu0  ;;  %v2488_v12 = vld [vmem:[#allocation10 + $0x10] sm:$0xff] }
 0x14c   :  { %v471_v26 = vrot.slane %v437_v23, 1  ;;  %v455_v29 = vsel %vm454_vm1, %v450_v9, %v451_v5  ;;  %v456_v30 = vsel %vm454_vm1, %v449_v45, %v450_v9 }
 0x14d   :  { %v479_v32 = vsel %vm473_vm2, %v472_v18, %v467_v41 }
 0x14e   :  { %v475_v35 = vsel %vm473_vm2, %v470_v54, %v471_v26  ;;  %v474_v36 = vsel %vm473_vm2, %v471_v26, %v472_v18 }
 0x150   :  { %v1559_v38 = vpop.f32.mrb[6].mxu1 }
 0x151   :  { %v462_v39 = vadd.f32 %v1559_v38, %v459_v42  ;;  %v313_v33 = vpop.f32.mrb[7].mxu1  ;;  %v2484_v42 = vld [vmem:[#allocation10 + $0x18] sm:$0xff] }
 0x152   :  { %v461_v48 = vadd.f32 %v460_v20, %v313_v33 }
 0x153   :  { %v2474_v51 = vadd.f32 %v477_v14, %v462_v39 }
 0x154   :  { %v2478_v45 = vadd.f32 %v478_v53, %v461_v48  ;;  %v1562_v59 = vpop.f32.mrb[8].mxu1  ;;  %v2500_v48 = vld [vmem:[#allocation10 + $0x20] sm:$0xff] }
 0x155   :  { %v489_v41 = vmul.f32 %v2474_v51, %v2472_v46  ;;  %v464_v54 = vadd.f32 %v1562_v59, %v457_v0  ;;  %v323_v63 = vpop.f32.mrb[9].mxu1 }
 0x156   :  { %v488_v5 = vmul.f32 %v2478_v45, %v2476_v58  ;;  %v463_v8 = vadd.f32 %v458_v3, %v323_v63  ;;  %v2496_v3 = vld [vmem:[#allocation10 + $0x28] sm:$0xff] }
 0x157   :  { %v2486_v9 = vadd.f32 %v475_v35, %v464_v54  ;;  %v506_v14 = vmul.f32 %v489_v41, %v489_v41 }
 0x158   :  { %v505_v18 = vmul.f32 %v488_v5, %v488_v5  ;;  %v2490_v53 = vadd.f32 %v476_v17, %v463_v8  ;;  %v1565_v20 = vpop.f32.mrb[10].mxu1  ;;  %v494_v38 = vadd.f32 %v489_v41, %v488_v5 }
 0x159   :  { %v491_v23 = vmul.f32 %v2486_v9, %v2484_v42  ;;  %v466_v0 = vadd.f32 %v1565_v20, %v455_v29  ;;  %v333_v26 = vpop.f32.mrb[11].mxu1 }
 0x15a   :  { %v490_v39 = vmul.f32 %v2490_v53, %v2488_v12  ;;  %v465_v33 = vadd.f32 %v456_v30, %v333_v26  ;;  %v511_v59 = vadd.f32 %v506_v14, %v505_v18 }
 0x15b   :  { %v2498_v35 = vadd.f32 %v479_v32, %v466_v0  ;;  %v508_v8 = vmul.f32 %v491_v23, %v491_v23 }
 0x15c   :  { %v495_v17 = vadd.f32 %v494_v38, %v490_v39  ;;  %v507_v54 = vmul.f32 %v490_v39, %v490_v39  ;;  %v2502_v63 = vadd.f32 %v474_v36, %v465_v33 }
 0x15d   :  { %v493_v29 = vmul.f32 %v2498_v35, %v2496_v3 }
 0x15e   :  { %v512_v24 = vadd.f32 %v511_v59, %v507_v54  ;;  %v492_v41 = vmul.f32 %v2502_v63, %v2500_v48  ;;  %v496_v30 = vadd.f32 %v495_v17, %v491_v23  ;;  %v708_v23 = vld [vmem:[#allocation7] sm:$0xff] }
 0x15f   :  { %v510_v0 = vmul.f32 %v493_v29, %v493_v29 }
 0x160   :  { %v497_v5 = vadd.f32 %v496_v30, %v492_v41  ;;  %v509_v20 = vmul.f32 %v492_v41, %v492_v41  ;;  %v513_v32 = vadd.f32 %v512_v24, %v508_v8  ;;  %v709_v24 = vld [vmem:[#allocation7 + $0x8] sm:$0xff]  ;;  %v932_v8 = vld [vmem:[#allocation7 + $0x100] sm:$0xff]  ;;  %v711_v30 = vld [vmem:[#allocation7 + $0x18] sm:$0xff] }
 0x161   :  { %v1841_v17 = vpack.c.bf16 %v709_v24, %v708_v23  ;;  %v940_v24 = vld [vmem:[#allocation7 + $0x140] sm:$0xff] }
 0x162   :  { %v498_v26 = vadd.f32 %v497_v5, %v493_v29  ;;  %v514_v21 = vadd.f32 %v513_v32, %v509_v20  ;;  %v933_v29 = vld [vmem:[#allocation7 + $0x108] sm:$0xff]  ;;  %v934_v20 = vld [vmem:[#allocation7 + $0x110] sm:$0xff]  ;;  %v935_v32 = vld [vmem:[#allocation7 + $0x118] sm:$0xff] }
 0x163   :  { %v1905_v41 = vpack.c.bf16 %v933_v29, %v932_v8  ;;  %1842 = vmatprep.subr.bf16.mxu0 %v1841_v17  ;;  %v718_v29 = vld [vmem:[#allocation7 + $0x50] sm:$0xff] }
 0x164   :  { %v499_v14 = vrot.slane %v498_v26, 4  ;;  %v515_v18 = vadd.f32 %v514_v21, %v510_v0  ;;  %1844 = vmatpush3.bf16.msra.mxu0 %v1841_v17  ;;  %v710_v21 = vld [vmem:[#allocation7 + $0x10] sm:$0xff]  ;;  %v1909_v0 = vpack.c.bf16 %v935_v32, %v934_v20  ;;  %v941_v17 = vld [vmem:[#allocation7 + $0x148] sm:$0xff]  ;;  %v720_v32 = vld [vmem:[#allocation7 + $0x60] sm:$0xff] }
 0x165   :  { %1906 = vmatprep.subr.bf16.mxu1 %v1905_v41  ;;  %v1845_v5 = vpack.c.bf16 %v711_v30, %v710_v21  ;;  %v1921_v8 = vpack.c.bf16 %v941_v17, %v940_v24  ;;  %v942_v30 = vld [vmem:[#allocation7 + $0x150] sm:$0xff] }
 0x166   :  { %v500_v38 = vadd.f32 %v499_v14, %v498_v26  ;;  %v516_v36 = vrot.slane %v515_v18, 4  ;;  %v714_v14 = vld [vmem:[#allocation7 + $0x30] sm:$0xff] }
 0x167   :  { %1846 = vmatprep.subr.bf16.mxu0 %v1845_v5 }
 0x168   :  { %v501_v39 = vrot.slane %v500_v38, 2  ;;  %v517_v33 = vadd.f32 %v516_v36, %v515_v18  ;;  %1848 = vmatpush3.bf16.msra.mxu0 %v1845_v5  ;;  %v715_v18 = vld [vmem:[#allocation7 + $0x38] sm:$0xff]  ;;  %v938_v36 = vld [vmem:[#allocation7 + $0x130] sm:$0xff] }
 0x169   :  { %v943_v5 = vld [vmem:[#allocation7 + $0x158] sm:$0xff] }
 0x16a   :  { %v502_v59 = vadd.f32 %v501_v39, %v500_v38  ;;  %v518_v54 = vrot.slane %v517_v33, 2  ;;  %v1853_v38 = vpack.c.bf16 %v715_v18, %v714_v14  ;;  %v939_v39 = vld [vmem:[#allocation7 + $0x138] sm:$0xff]  ;;  %v1925_v20 = vpack.c.bf16 %v943_v5, %v942_v30  ;;  %v946_v14 = vld [vmem:[#allocation7 + $0x170] sm:$0xff] }
 0x16b   :  { %v947_v18 = vld [vmem:[#allocation7 + $0x178] sm:$0xff]  ;;  %v486_v5 = vld [vmem:[%s2661_s3] sm:$0x1] }
 0x16c   :  { %v519_v15 = vadd.f32 %v518_v54, %v517_v33  ;;  %v503_v11 = vrot.slane %v502_v59, 1  ;;  %v1917_v33 = vpack.c.bf16 %v939_v39, %v938_v36  ;;  %v717_v54 = vld [vmem:[#allocation7 + $0x48] sm:$0xff]  ;;  %v1933_v36 = vpack.c.bf16 %v947_v18, %v946_v14  ;;  %v820_v39 = vld [vmem:[#allocation7 + $0x80] sm:$0xff] }
 0x16e   :  { %v520_v6 = vrot.slane %v519_v15, 1  ;;  %v504_v60 = vadd.f32 %v503_v11, %v502_v59  ;;  %v936_v11 = vld [vmem:[#allocation7 + $0x120] sm:$0xff] }
 0x16f   :  { %v716_v59 = vld [vmem:[#allocation7 + $0x40] sm:$0xff] }
 0x170   :  { %v521_v2 = vadd.f32 %v520_v6, %v519_v15  ;;  %v937_v15 = vld [vmem:[#allocation7 + $0x128] sm:$0xff]  ;;  %v1857_v23 = vpack.c.bf16 %v717_v54, %v716_v59 }
 0x171   :  { %v1913_v26 = vpack.c.bf16 %v937_v15, %v936_v11  ;;  %v722_v11 = vld [vmem:[#allocation7 + $0x70] sm:$0xff] }
 0x172   :  { %650 = vmatprep.mubr.f32.mxu1 %v521_v2  ;;  %v713_v2 = vld [vmem:[#allocation7 + $0x28] sm:$0xff] }
 0x173   :  { %651 = vmatmul.mubr.f32.vlgmr.msra.gmra.mrb[12].mxu1 %v504_v60  ;;  %v712_v60 = vld [vmem:[#allocation7 + $0x20] sm:$0xff] }
 0x174   :  { %1908 = vmatpush3.bf16.msra.mxu1 %v1905_v41  ;;  %v1849_v6 = vpack.c.bf16 %v713_v2, %v712_v60  ;;  %v719_v41 = vld [vmem:[#allocation7 + $0x58] sm:$0xff]  ;;  %v944_v2 = vld [vmem:[#allocation7 + $0x160] sm:$0xff] }
 0x175   :  { %1910 = vmatprep.subr.bf16.mxu1 %v1909_v0  ;;  %v1861_v21 = vpack.c.bf16 %v719_v41, %v718_v29 }
 0x176   :  { %1850 = vmatprep.subr.bf16.mxu0 %v1849_v6 }
 0x177   :  { %1852 = vmatpush3.bf16.msra.mxu0 %v1849_v6  ;;  %v945_v6 = vld [vmem:[#allocation7 + $0x168] sm:$0xff] }
 0x178   :  { %1912 = vmatpush3.bf16.msra.mxu1 %v1909_v0  ;;  %1854 = vmatprep.subr.bf16.mxu0 %v1853_v38  ;;  %v721_v0 = vld [vmem:[#allocation7 + $0x68] sm:$0xff]  ;;  %v1929_v15 = vpack.c.bf16 %v945_v6, %v944_v2 }
 0x179   :  { %1914 = vmatprep.subr.bf16.mxu1 %v1913_v26  ;;  %v1865_v60 = vpack.c.bf16 %v721_v0, %v720_v32 }
 0x17b   :  { %1856 = vmatpush3.bf16.msra.mxu0 %v1853_v38 }
 0x17c   :  { %1916 = vmatpush3.bf16.msra.mxu1 %v1913_v26  ;;  %1858 = vmatprep.subr.bf16.mxu0 %v1857_v23  ;;  %v723_v26 = vld [vmem:[#allocation7 + $0x78] sm:$0xff] }
 0x17d   :  { %1918 = vmatprep.subr.bf16.mxu1 %v1917_v33  ;;  %v1869_v38 = vpack.c.bf16 %v723_v26, %v722_v11 }
 0x17f   :  { %1860 = vmatpush3.bf16.msra.mxu0 %v1857_v23 }
 0x180   :  { %1920 = vmatpush3.bf16.msra.mxu1 %v1917_v33  ;;  %1862 = vmatprep.subr.bf16.mxu0 %v1861_v21  ;;  %v821_v33 = vld [vmem:[#allocation7 + $0x88] sm:$0xff] }
 0x181   :  { %1922 = vmatprep.subr.bf16.mxu1 %v1921_v8  ;;  %v1873_v59 = vpack.c.bf16 %v821_v33, %v820_v39 }
 0x183   :  { %1864 = vmatpush3.bf16.msra.mxu0 %v1861_v21  ;;  %v2509_v21 = vsub.s32 0, %v2444_v27 }
 0x184   :  { %1924 = vmatpush3.bf16.msra.mxu1 %v1921_v8  ;;  %1866 = vmatprep.subr.bf16.mxu0 %v1865_v60 }
 0x185   :  { %1926 = vmatprep.subr.bf16.mxu1 %v1925_v20 }
 0x187   :  { %1868 = vmatpush3.bf16.msra.mxu0 %v1865_v60 }
 0x188   :  { %1928 = vmatpush3.bf16.msra.mxu1 %v1925_v20  ;;  %1870 = vmatprep.subr.bf16.mxu0 %v1869_v38 }
 0x189   :  { %1930 = vmatprep.subr.bf16.mxu1 %v1929_v15 }
 0x18b   :  { %1872 = vmatpush3.bf16.msra.mxu0 %v1869_v38 }
 0x18c   :  { %1932 = vmatpush3.bf16.msra.mxu1 %v1929_v15  ;;  %1874 = vmatprep.subr.bf16.mxu0 %v1873_v59  ;;  %v1396_v15 = vld [vmem:[%s2662_s4] ss:$0 sm:$0xff] }
 0x18d   :  { %1934 = vmatprep.subr.bf16.mxu1 %v1933_v36 }
 0x190   :  { %1936 = vmatpush3.bf16.msra.mxu1 %v1933_v36 }
 0x246   :  { %v652_v54 = vpop.f32.mrb[12].mxu1 }
 0x247   :  { %v657_v23 = vmul.f32 0.001953125, %v652_v54  ;;  %v654_v24 = vpop.f32.mrb[13].mxu1 }
 0x248   :  { %v658_v17 = vmul.f32 0.001953125, %v654_v24 }
 0x249   :  { %v659_v8 = vmul.f32 %v657_v23, %v657_v23  ;;  %v667_v30 = vrot.slane %v657_v23, %v2509_v21 }
 0x24b   :  { %v660_v29 = vsub.f32 %v658_v17, %v659_v8  ;;  %v668_v0 = vsub.f32 %v2478_v45, %v667_v30  ;;  %v669_v2 = vsub.f32 %v2474_v51, %v667_v30  ;;  %v670_v6 = vsub.f32 %v2490_v53, %v667_v30  ;;  %v822_v8 = vld [vmem:[#allocation7 + $0x90] sm:$0xff] }
 0x24c   :  { %v671_v11 = vsub.f32 %v2486_v9, %v667_v30  ;;  %v672_v26 = vsub.f32 %v2502_v63, %v667_v30  ;;  %v673_v14 = vsub.f32 %v2498_v35, %v667_v30 }
 0x24d   :  { %v661_v41 = vadd.f32 1e-05, %v660_v29  ;;  %v823_v29 = vld [vmem:[#allocation7 + $0x98] sm:$0xff] }
 0x24e   :  { %v1877_v30 = vpack.c.bf16 %v823_v29, %v822_v8 }
 0x24f   :  { %2034 = vrsqrt.f32 %v661_v41 }
 0x259   :  { %v2035_v20 = vpop.eup %2034 }
 0x25a   :  { %v663_v32 = vmul.f32 %v2035_v20, %v486_v5 }
 0x25c   :  { %v677_v60 = vrot.slane %v663_v32, %v2509_v21 }
 0x25e   :  { %v678_v18 = vmul.f32 %v677_v60, %v668_v0  ;;  %v679_v38 = vmul.f32 %v677_v60, %v669_v2  ;;  %v680_v36 = vmul.f32 %v677_v60, %v670_v6  ;;  %v681_v45 = vmul.f32 %v677_v60, %v671_v11  ;;  %v825_v2 = vld [vmem:[#allocation7 + $0xa8] sm:$0xff] }
 0x25f   :  { %v682_v39 = vmul.f32 %v677_v60, %v672_v26  ;;  %v683_v33 = vmul.f32 %v677_v60, %v673_v14  ;;  %v824_v60 = vld [vmem:[#allocation7 + $0xa0] sm:$0xff] }
 0x260   :  { %v690_v54 = vadd.f32 %v1396_v15, %v678_v18  ;;  %v691_v51 = vadd.f32 %v1396_v15, %v679_v38  ;;  %v692_v23 = vadd.f32 %v1396_v15, %v680_v36  ;;  %v693_v53 = vadd.f32 %v1396_v15, %v681_v45  ;;  %v827_v18 = vld [vmem:[#allocation7 + $0xb8] sm:$0xff]  ;;  %v828_v36 = vld [vmem:[#allocation7 + $0xc0] sm:$0xff]  ;;  %v829_v45 = vld [vmem:[#allocation7 + $0xc8] sm:$0xff] }
 0x261   :  { %v694_v41 = vadd.f32 %v1396_v15, %v682_v39  ;;  %v695_v20 = vadd.f32 %v1396_v15, %v683_v33  ;;  %v1881_v11 = vpack.c.bf16 %v825_v2, %v824_v60  ;;  %v826_v15 = vld [vmem:[#allocation7 + $0xb0] sm:$0xff]  ;;  %v1889_v39 = vpack.c.bf16 %v829_v45, %v828_v36 }
 0x262   :  { %v696_v24 = vmax.f32 %v690_v54, 0.0  ;;  %v697_v9 = vmax.f32 %v691_v51, 0.0  ;;  %v698_v17 = vmax.f32 %v692_v23, 0.0  ;;  %v699_v5 = vmax.f32 %v693_v53, 0.0  ;;  %v830_v33 = vld [vmem:[#allocation7 + $0xd0] sm:$0xff]  ;;  %v831_v54 = vld [vmem:[#allocation7 + $0xd8] sm:$0xff] }
 0x263   :  { %v700_v0 = vmax.f32 %v694_v41, 0.0  ;;  %v701_v26 = vmax.f32 %v695_v20, 0.0  ;;  %v1893_v51 = vpack.c.bf16 %v831_v54, %v830_v33  ;;  %v832_v23 = vld [vmem:[#allocation7 + $0xe0] sm:$0xff]  ;;  %v833_v53 = vld [vmem:[#allocation7 + $0xe8] sm:$0xff] }
 0x264   :  { %v702_v63 = vmul.f32 %v696_v24, %v2476_v58  ;;  %v703_v35 = vmul.f32 %v697_v9, %v2472_v46  ;;  %v704_v32 = vmul.f32 %v698_v17, %v2488_v12  ;;  %v705_v6 = vmul.f32 %v699_v5, %v2484_v42  ;;  %v834_v9 = vld [vmem:[#allocation7 + $0xf0] sm:$0xff]  ;;  %v835_v17 = vld [vmem:[#allocation7 + $0xf8] sm:$0xff] }
 0x265   :  { %v706_v14 = vmul.f32 %v700_v0, %v2500_v48  ;;  %v707_v38 = vmul.f32 %v701_v26, %v2496_v3  ;;  %v1897_v24 = vpack.c.bf16 %v833_v53, %v832_v23  ;;  %v1901_v8 = vpack.c.bf16 %v835_v17, %v834_v9 }
 0x266   :  { %1623 = vmatprep.mubr.f32.mxu0 %v702_v63  ;;  %1705 = vmatprep.mubr.f32.mxu1 %v702_v63 }
 0x267   :  { %1624 = vmatmul.mubr.f32.vlgmr.msra.gmra.mrb[6].mxu0 %v703_v35  ;;  %1706 = vmatmul.mubr.f32.vlgmr.msra.gmra.mrb[14].mxu1 %v703_v35 }
 0x268   :  { %1876 = vmatpush3.bf16.msra.mxu0 %v1873_v59  ;;  %1626 = vmatprep.mubr.f32.mxu0 %v704_v32  ;;  %v1885_v59 = vpack.c.bf16 %v827_v18, %v826_v15 }
 0x269   :  { %1708 = vmatprep.mubr.f32.mxu1 %v704_v32  ;;  %1878 = vmatprep.subr.bf16.mxu0 %v1877_v30 }
 0x26b   :  { %1627 = vmatmul.mubr.f32.gmra.mrb[8].mxu0 %v705_v6  ;;  %1709 = vmatmul.mubr.f32.gmra.mrb[16].mxu1 %v705_v6 }
 0x26c   :  { %1880 = vmatpush3.bf16.msra.mxu0 %v1877_v30  ;;  %1629 = vmatprep.mubr.f32.mxu0 %v706_v14 }
 0x26d   :  { %1711 = vmatprep.mubr.f32.mxu1 %v706_v14  ;;  %1882 = vmatprep.subr.bf16.mxu0 %v1881_v11 }
 0x26f   :  { %1630 = vmatmul.mubr.f32.gmra.mrb[10].mxu0 %v707_v38  ;;  %1712 = vmatmul.mubr.f32.gmra.mrb[18].mxu1 %v707_v38 }
 0x270   :  { %1884 = vmatpush3.bf16.msra.mxu0 %v1881_v11  ;;  %1664 = vmatprep.mubr.f32.mxu0 %v702_v63 }
 0x271   :  { %1886 = vmatprep.subr.bf16.mxu0 %v1885_v59 }
 0x274   :  { %1888 = vmatpush3.bf16.msra.mxu0 %v1885_v59 }
 0x275   :  { %1890 = vmatprep.subr.bf16.mxu0 %v1889_v39 }
 0x278   :  { %1892 = vmatpush3.bf16.msra.mxu0 %v1889_v39 }
 0x279   :  { %1894 = vmatprep.subr.bf16.mxu0 %v1893_v51 }
 0x27c   :  { %1896 = vmatpush3.bf16.msra.mxu0 %v1893_v51 }
 0x27d   :  { %1898 = vmatprep.subr.bf16.mxu0 %v1897_v24 }
 0x280   :  { %1900 = vmatpush3.bf16.msra.mxu0 %v1897_v24 }
 0x281   :  { %1902 = vmatprep.subr.bf16.mxu0 %v1901_v8 }
 0x284   :  { %1904 = vmatpush3.bf16.msra.mxu0 %v1901_v8 }
 0x285   :  { %1938 = vmatprep.subr.bf16.mxu0 %v2343_v44  ;;  %v2683_v44 = vld [vmem:[#allocation16_spill] sm:$0xff] }
 0x287   :  { %1665 = vmatmul.mubr.f32.vlgmr.msra.gmra.mrb[12].mxu0 %v703_v35 }
 0x288   :  { %1667 = vmatprep.mubr.f32.mxu0 %v704_v32  ;;  %1940 = vmatpush1.bf16.msra.mxu0 %v2345_v49  ;;  %v2684_v49 = vld [vmem:[#allocation17_spill] sm:$0xff] }
 0x289   :  { %1942 = vmatprep.subr.bf16.mxu0 %v2348_v50  ;;  %v2685_v50 = vld [vmem:[#allocation18_spill] sm:$0xff] }
 0x28b   :  { %1668 = vmatmul.mubr.f32.gmra.mrb[14].mxu0 %v705_v6 }
 0x28c   :  { %1670 = vmatprep.mubr.f32.mxu0 %v706_v14  ;;  %1944 = vmatpush1.bf16.msra.mxu0 %v2353_v55  ;;  %v2686_v55 = vld [vmem:[#allocation19_spill] sm:$0xff] }
 0x28d   :  { %1946 = vmatprep.subr.bf16.mxu0 %v2356_v56  ;;  %v2687_v56 = vld [vmem:[#allocation20_spill] sm:$0xff] }
 0x28f   :  { %1671 = vmatmul.mubr.f32.gmra.mrb[16].mxu0 %v707_v38 }
 0x290   :  { %1948 = vmatpush1.bf16.msra.mxu0 %v2361_v61  ;;  %v2688_v61 = vld [vmem:[#allocation21_spill] sm:$0xff] }
 0x291   :  { %1950 = vmatprep.subr.bf16.mxu0 %v2364_v62  ;;  %v2689_v62 = vld [vmem:[#allocation22_spill] sm:$0xff] }
 0x294   :  { %1952 = vmatpush1.bf16.msra.mxu0 %v2369_v1 }
 0x295   :  { %1954 = vmatprep.subr.bf16.mxu0 %v2372_v4 }
 0x298   :  { %1956 = vmatpush1.bf16.msra.mxu0 %v2374_v7 }
 0x299   :  { %1958 = vmatprep.subr.bf16.mxu0 %v2378_v10 }
 0x29c   :  { %1960 = vmatpush1.bf16.msra.mxu0 %v2380_v13 }
 0x29d   :  { %1962 = vmatprep.subr.bf16.mxu0 %v2384_v16 }
 0x2a0   :  { %1964 = vmatpush1.bf16.msra.mxu0 %v2386_v19 }
 0x2a1   :  { %1966 = vmatprep.subr.bf16.mxu0 %v2390_v22 }
 0x2a4   :  { %1968 = vmatpush1.bf16.msra.mxu0 %v2393_v25 }
 0x2a5   :  { %1970 = vmatprep.subr.bf16.mxu0 %v2396_v28 }
 0x2a8   :  { %1972 = vmatpush1.bf16.msra.mxu0 %v2398_v31 }
 0x2a9   :  { %1974 = vmatprep.subr.bf16.mxu0 %v2402_v34 }
 0x2ac   :  { %1976 = vmatpush1.bf16.msra.mxu0 %v2404_v37 }
 0x2ad   :  { %1978 = vmatprep.subr.bf16.mxu0 %v2408_v40 }
 0x2b0   :  { %1980 = vmatpush1.bf16.msra.mxu0 %v2410_v43 }
 0x2b1   :  { %1982 = vmatprep.subr.bf16.mxu0 %v2414_v47 }
 0x2b4   :  { %1984 = vmatpush1.bf16.msra.mxu0 %v2416_v52 }
 0x2b5   :  { %1986 = vmatprep.subr.bf16.mxu0 %v2420_v57 }
 0x2b8   :  { %1988 = vmatpush1.bf16.msra.mxu0 %v2683_v44 }
 0x2b9   :  { %1990 = vmatprep.subr.bf16.mxu0 %v2684_v49 }
 0x2bc   :  { %1992 = vmatpush1.bf16.msra.mxu0 %v2685_v50 }
 0x2bd   :  { %1994 = vmatprep.subr.bf16.mxu0 %v2686_v55 }
 0x2c0   :  { %1996 = vmatpush1.bf16.msra.mxu0 %v2687_v56 }
 0x2c1   :  { %1998 = vmatprep.subr.bf16.mxu0 %v2688_v61 }
 0x2c4   :  { %2000 = vmatpush1.bf16.msra.mxu0 %v2689_v62 }
 0x33a   :  { %v1625_v1 = vpop.f32.mrb[6].mxu0  ;;  %v1707_v4 = vpop.f32.mrb[14].mxu1 }
 0x33b   :  { %v1044_v7 = vrot.slane %v1625_v1, 7  ;;  %v1062_v10 = vrot.slane %v1707_v4, 1  ;;  %v790_v13 = vpop.f32.mrb[7].mxu0  ;;  %v1014_v16 = vpop.f32.mrb[15].mxu1 }
 0x33c   :  { %v1043_v19 = vrot.slane %v790_v13, 7  ;;  %v1061_v22 = vrot.slane %v1014_v16, 1 }
 0x33e   :  { %v1628_v25 = vpop.f32.mrb[8].mxu0  ;;  %v1710_v28 = vpop.f32.mrb[16].mxu1  ;;  %v1053_v31 = vsel %vm454_vm1, %v1043_v19, %v1044_v7  ;;  %v1071_v34 = vsel %vm473_vm2, %v1061_v22, %v1062_v10 }
 0x33f   :  { %v1046_v37 = vrot.slane %v1628_v25, 7  ;;  %v1064_v40 = vrot.slane %v1710_v28, 1  ;;  %v800_v43 = vpop.f32.mrb[9].mxu0  ;;  %v1024_v47 = vpop.f32.mrb[17].mxu1 }
 0x340   :  { %v1045_v52 = vrot.slane %v800_v43, 7  ;;  %v1063_v57 = vrot.slane %v1024_v47, 1 }
 0x342   :  { %v1631_v29 = vpop.f32.mrb[10].mxu0  ;;  %v1713_v41 = vpop.f32.mrb[18].mxu1  ;;  %v1070_v63 = vsel %vm473_vm2, %v1062_v10, %v1063_v57  ;;  %v1051_v35 = vsel %vm454_vm1, %v1045_v52, %v1046_v37  ;;  %v1052_v30 = vsel %vm454_vm1, %v1044_v7, %v1045_v52  ;;  %v1069_v5 = vsel %vm473_vm2, %v1063_v57, %v1064_v40 }
 0x343   :  { %v1048_v20 = vrot.slane %v1631_v29, 7  ;;  %v1066_v32 = vrot.slane %v1713_v41, 1  ;;  %v810_v0 = vpop.f32.mrb[11].mxu0  ;;  %v1034_v60 = vpop.f32.mrb[19].mxu1 }
 0x344   :  { %v1047_v2 = vrot.slane %v810_v0, 7  ;;  %v1065_v6 = vrot.slane %v1034_v60, 1 }
 0x345   :  { %v1054_v11 = vsel %vm454_vm1, %v1048_v20, %v1043_v19  ;;  %v1072_v26 = vsel %vm473_vm2, %v1066_v32, %v1061_v22 }
 0x346   :  { %v1068_v14 = vsel %vm473_vm2, %v1064_v40, %v1065_v6  ;;  %v1049_v15 = vsel %vm454_vm1, %v1047_v2, %v1048_v20  ;;  %v1050_v18 = vsel %vm454_vm1, %v1046_v37, %v1047_v2  ;;  %v1067_v38 = vsel %vm473_vm2, %v1065_v6, %v1066_v32 }
 0x35a   :  { %v1666_v59 = vpop.f32.mrb[12].mxu0 }
 0x35b   :  { %v1056_v36 = vadd.f32 %v1666_v59, %v1053_v31  ;;  %v902_v45 = vpop.f32.mrb[13].mxu0 }
 0x35c   :  { %v1055_v39 = vadd.f32 %v1054_v11, %v902_v45 }
 0x35d   :  { %v2587_v33 = vadd.f32 %v1070_v63, %v1056_v36 }
 0x35e   :  { %v2589_v54 = vadd.f32 %v1071_v34, %v1055_v39  ;;  %v1669_v51 = vpop.f32.mrb[14].mxu0 }
 0x35f   :  { %v1082_v23 = vmul.f32 %v2587_v33, %v2472_v46  ;;  %v1058_v53 = vadd.f32 %v1669_v51, %v1051_v35  ;;  %v912_v24 = vpop.f32.mrb[15].mxu0  ;;  %v1079_v51 = vld [vmem:[%s2663_s5] sm:$0x1]  ;;  %s2187_s5 = smov 120  }
 0x360   :  { %v1081_v9 = vmul.f32 %v2589_v54, %v2476_v58  ;;  %v1057_v17 = vadd.f32 %v1052_v30, %v912_v24 }
 0x361   :  { %v2595_v8 = vadd.f32 %v1068_v14, %v1058_v53  ;;  %v1099_v44 = vmul.f32 %v1082_v23, %v1082_v23 }
 0x362   :  { %v1098_v49 = vmul.f32 %v1081_v9, %v1081_v9  ;;  %v2597_v50 = vadd.f32 %v1069_v5, %v1057_v17  ;;  %v1672_v55 = vpop.f32.mrb[16].mxu0  ;;  %v1087_v1 = vadd.f32 %v1082_v23, %v1081_v9 }
 0x363   :  { %v1084_v56 = vmul.f32 %v2595_v8, %v2484_v42  ;;  %v1060_v61 = vadd.f32 %v1672_v55, %v1049_v15  ;;  %v922_v62 = vpop.f32.mrb[17].mxu0  ;;  %v1397_v55 = vld [vmem:[%s2664_s6] ss:$0 sm:$0xff] }
 0x364   :  { %v1083_v4 = vmul.f32 %v2597_v50, %v2488_v12  ;;  %v1059_v7 = vadd.f32 %v1050_v18, %v922_v62  ;;  %v1104_v13 = vadd.f32 %v1099_v44, %v1098_v49 }
 0x365   :  { %v1078_v10 = vadd.f32 %v1072_v26, %v1060_v61  ;;  %v1101_v25 = vmul.f32 %v1084_v56, %v1084_v56 }
 0x366   :  { %v1088_v16 = vadd.f32 %v1087_v1, %v1083_v4  ;;  %v1100_v19 = vmul.f32 %v1083_v4, %v1083_v4  ;;  %v1077_v22 = vadd.f32 %v1067_v38, %v1059_v7 }
 0x367   :  { %v1086_v31 = vmul.f32 %v1078_v10, %v2496_v3 }
 0x368   :  { %v1105_v28 = vadd.f32 %v1104_v13, %v1100_v19  ;;  %v1085_v34 = vmul.f32 %v1077_v22, %v2500_v48  ;;  %v1089_v37 = vadd.f32 %v1088_v16, %v1084_v56 }
 0x369   :  { %v1103_v52 = vmul.f32 %v1086_v31, %v1086_v31 }
 0x36a   :  { %v1090_v40 = vadd.f32 %v1089_v37, %v1085_v34  ;;  %v1102_v43 = vmul.f32 %v1085_v34, %v1085_v34  ;;  %v1106_v47 = vadd.f32 %v1105_v28, %v1101_v25 }
 0x36c   :  { %v1091_v57 = vadd.f32 %v1090_v40, %v1086_v31  ;;  %v1107_v29 = vadd.f32 %v1106_v47, %v1102_v43 }
 0x36e   :  { %v1092_v41 = vrot.slane %v1091_v57, 4  ;;  %v1108_v63 = vadd.f32 %v1107_v29, %v1103_v52 }
 0x370   :  { %v1093_v35 = vadd.f32 %v1092_v41, %v1091_v57  ;;  %v1109_v30 = vrot.slane %v1108_v63, 4 }
 0x372   :  { %v1094_v5 = vrot.slane %v1093_v35, 2  ;;  %v1110_v20 = vadd.f32 %v1109_v30, %v1108_v63 }
 0x374   :  { %v1095_v32 = vadd.f32 %v1094_v5, %v1093_v35  ;;  %v1111_v0 = vrot.slane %v1110_v20, 2 }
 0x376   :  { %v1112_v60 = vadd.f32 %v1111_v0, %v1110_v20  ;;  %v1096_v2 = vrot.slane %v1095_v32, 1 }
 0x378   :  { %v1113_v6 = vrot.slane %v1112_v60, 1  ;;  %v1097_v26 = vadd.f32 %v1096_v2, %v1095_v32 }
 0x37a   :  { %v1114_v11 = vadd.f32 %v1113_v6, %v1112_v60 }
 0x37c   :  { %1179 = vmatprep.mubr.f32.mxu0 %v1114_v11 }
 0x37d   :  { %1180 = vmatmul.mubr.f32.vlgmr.msra.gmra.mrb[18].mxu0 %v1097_v26 }
 0x450   :  { %v1181_v14 = vpop.f32.mrb[18].mxu0 }
 0x451   :  { %v1186_v15 = vmul.f32 0.001953125, %v1181_v14  ;;  %v1183_v18 = vpop.f32.mrb[19].mxu0 }
 0x452   :  { %v1187_v38 = vmul.f32 0.001953125, %v1183_v18 }
 0x453   :  { %v1188_v59 = vmul.f32 %v1186_v15, %v1186_v15  ;;  %v1196_v39 = vrot.slane %v1186_v15, %v2509_v21 }
 0x455   :  { %v1189_v36 = vsub.f32 %v1187_v38, %v1188_v59  ;;  %v1200_v24 = vsub.f32 %v2595_v8, %v1196_v39  ;;  %v1201_v17 = vsub.f32 %v1077_v22, %v1196_v39  ;;  %v1197_v44 = vsub.f32 %v2589_v54, %v1196_v39 }
 0x456   :  { %v1198_v49 = vsub.f32 %v2587_v33, %v1196_v39  ;;  %v1202_v56 = vsub.f32 %v1078_v10, %v1196_v39  ;;  %v1199_v61 = vsub.f32 %v2597_v50, %v1196_v39 }
 0x457   :  { %v1190_v45 = vadd.f32 1e-05, %v1189_v36 }
 0x459   :  { %2036 = vrsqrt.f32 %v1190_v45 }
 0x463   :  { %v2037_v23 = vpop.eup %2036 }
 0x464   :  { %v1192_v53 = vmul.f32 %v2037_v23, %v1079_v51 }
 0x466   :  { %v1206_v9 = vrot.slane %v1192_v53, %v2509_v21 }
 0x468   :  { %v1210_v62 = vmul.f32 %v1206_v9, %v1200_v24  ;;  %v1211_v1 = vmul.f32 %v1206_v9, %v1201_v17  ;;  %v1207_v4 = vmul.f32 %v1206_v9, %v1197_v44  ;;  %v1208_v7 = vmul.f32 %v1206_v9, %v1198_v49 }
 0x469   :  { %v1212_v13 = vmul.f32 %v1206_v9, %v1202_v56  ;;  %v1209_v8 = vmul.f32 %v1206_v9, %v1199_v61  ;;  %v1274_v61 = vld [vmem:[%s2666_s8 + $0x8] sm:$0xff] }
 0x46a   :  { %v1222_v16 = vadd.f32 %v1397_v55, %v1210_v62  ;;  %v1223_v21 = vadd.f32 %v1397_v55, %v1211_v1  ;;  %v1219_v19 = vadd.f32 %v1397_v55, %v1207_v4  ;;  %v1220_v22 = vadd.f32 %v1397_v55, %v1208_v7 }
 0x46b   :  { %v1224_v54 = vadd.f32 %v1397_v55, %v1212_v13  ;;  %v1221_v25 = vadd.f32 %v1397_v55, %v1209_v8 }
 0x46c   :  { %v1228_v33 = vmax.f32 %v1222_v16, 0.0  ;;  %v1229_v28 = vmax.f32 %v1223_v21, 0.0  ;;  %v1225_v31 = vmax.f32 %v1219_v19, 0.0  ;;  %v1226_v34 = vmax.f32 %v1220_v22, 0.0 }
 0x46d   :  { %v1230_v52 = vmax.f32 %v1224_v54, 0.0  ;;  %v1227_v57 = vmax.f32 %v1221_v25, 0.0 }
 0x46e   :  { %v1234_v10 = vmul.f32 %v1228_v33, %v2484_v42  ;;  %v1235_v50 = vmul.f32 %v1229_v28, %v2500_v48  ;;  %v1231_v37 = vmul.f32 %v1225_v31, %v2476_v58  ;;  %v1232_v40 = vmul.f32 %v1226_v34, %v2472_v46  ;;  %v1273_v42 = vld [vmem:[%s2666_s8] sm:$0xff] }
 0x46f   :  { %v1236_v29 = vmul.f32 %v1230_v52, %v2496_v3  ;;  %v1233_v41 = vmul.f32 %v1227_v57, %v2488_v12  ;;  %1726 = vmatprep.mubr.msk.f32.mxu1 %vm1275_vm3, %v1273_v42 }
 0x470   :  { %v2029_v43 = vpack.i.bf16 %v1235_v50, %v1234_v10  ;;  %v2024_v47 = vpack.i.bf16 %v1232_v40, %v1231_v37 }
 0x472   :  { %2030 = vrot.lane.b32.xlu1 %v2029_v43, %s2187_s5  ;;  %2025 = vrot.lane.b32.xlu0 %v2024_v47, %s2187_s5 }
 0x476   :  { %1247 = vrot.lane.b32.xlu1 %v1236_v29, %s2187_s5  ;;  %1241 = vrot.lane.b32.xlu0 %v1233_v41, %s2187_s5 }
 0x4e4   :  { %v2031_v46 = vpop.permute.xlu1 %2030  ;;  %v2026_v58 = vpop.permute.xlu0 %2025 }
 0x4e5   :  { %v2033_v48 = vunpack.i.h.bf16 %v2031_v46  ;;  %v2032_v63 = vunpack.i.l.bf16 %v2031_v46  ;;  %v2028_v35 = vunpack.i.h.bf16 %v2026_v58  ;;  %v2027_v30 = vunpack.i.l.bf16 %v2026_v58 }
 0x4e7   :  { %v1253_v5 = vmax.f32 %v1235_v50, %v2033_v48  ;;  %v1252_v20 = vmax.f32 %v1234_v10, %v2032_v63  ;;  %v1250_v3 = vmax.f32 %v1232_v40, %v2028_v35  ;;  %v1249_v32 = vmax.f32 %v1231_v37, %v2027_v30 }
 0x4e8   :  { %v1248_v12 = vpop.permute.xlu1 %1247  ;;  %v1242_v0 = vpop.permute.xlu0 %1241 }
 0x4e9   :  { %v1256_v60 = vrot.slane %v1250_v3, 1  ;;  %v1255_v2 = vrot.slane %v1249_v32, 1  ;;  %v1259_v6 = vrot.slane %v1253_v5, 1  ;;  %v1258_v11 = vrot.slane %v1252_v20, 1 }
 0x4ea   :  { %v1254_v26 = vmax.f32 %v1236_v29, %v1248_v12  ;;  %v1251_v14 = vmax.f32 %v1233_v41, %v1242_v0 }
 0x4eb   :  { %v1265_v15 = vsel %vm473_vm2, %v1255_v2, %v1256_v60  ;;  %v1262_v59 = vsel %vm473_vm2, %v1258_v11, %v1259_v6 }
 0x4ec   :  { %v1260_v18 = vrot.slane %v1254_v26, 1  ;;  %v1257_v38 = vrot.slane %v1251_v14, 1  ;;  %v1267_v39 = vmax.f32 %v1249_v32, %v1265_v15  ;;  %v1270_v9 = vmax.f32 %v1252_v20, %v1262_v59 }
 0x4ee   :  { %v1263_v36 = vsel %vm473_vm2, %v1257_v38, %v1258_v11  ;;  %v1264_v45 = vsel %vm473_vm2, %v1256_v60, %v1257_v38  ;;  %v1266_v53 = vsel %vm473_vm2, %v1260_v18, %v1255_v2  ;;  %v1261_v24 = vsel %vm473_vm2, %v1259_v6, %v1260_v18 }
 0x4ef   :  { %v1269_v51 = vmax.f32 %v1251_v14, %v1263_v36  ;;  %v1268_v23 = vmax.f32 %v1250_v3, %v1264_v45  ;;  %v1272_v44 = vmax.f32 %v1254_v26, %v1266_v53  ;;  %v1271_v55 = vmax.f32 %v1253_v5, %v1261_v24 }
 0x4f1   :  { %v2001_v17 = vpack.c.bf16 %v1268_v23, %v1267_v39  ;;  %v2005_v49 = vpack.c.bf16 %v1270_v9, %v1269_v51  ;;  %v2009_v56 = vpack.c.bf16 %v1272_v44, %v1271_v55 }
 0x4f3   :  { %2002 = vmatprep.subr.bf16.mxu1 %v2001_v17 }
 0x4f4   :  { %2004 = vmatpush3.bf16.msra.mxu1 %v2001_v17 }
 0x4f5   :  { %2006 = vmatprep.subr.bf16.mxu1 %v2005_v49 }
 0x4f8   :  { %2008 = vmatpush3.bf16.msra.mxu1 %v2005_v49 }
 0x4f9   :  { %2010 = vmatprep.subr.bf16.mxu1 %v2009_v56 }
 0x4fc   :  { %2012 = vmatpush3.bf16.msra.mxu1 %v2009_v56 }
 0x4ff   :  { %1727 = vmatmul.mubr.msk.f32.vlgmr.msra.gmra.mrb[20].mxu1 %vm1275_vm3, %v1274_v61 }
 0x5d2   :  { %v1728_v27 = vpop.f32.mrb[20].mxu1 }
 0x5d3   :  { %1358 = vst [vmem:[#allocation11 + $0x8] sm:$0xff] %v1728_v27  ;;  %v1348_v62 = vpop.f32.mrb[21].mxu1 }
 0x5d4   :  { %1357 = vst [vmem:[#allocation11] sm:$0xff] %v1348_v62 }
 0x5d5   :  { %2159 = shalt.err (!%p2156_p2)
}
 0x5d6   :  { %s2160_s8 = scalar_lea.hbm %s2668_s10, 256 }
 0x5d7   :  { %p2161_p3 = scmp.ne.s32.totalorder %s2668_s10, %s2160_s8  ;;  %p2164_p4 = scmp.lt.u32.totalorder %s2160_s8, %s2668_s10 }
 0x5d9   :  { %p2166_p5 = pnand %p2164_p4, %p2161_p3 }
 0x5db   :  { %2169 = shalt.err (!%p2166_p5)
}
 0x5dc   :  { %1370 = dma.vmem_to_hbm [thread:$0]  %s1365_s22, 256, %s2668_s10, [#allocation4], %s2180_s25, %s2180_s25, %s2181_s26  }
 0x5dd   :  { %2176 = dma.done.wait [#allocation4], 256  }
 0x5de   :  { %2177 = vsyncadd [#allocation4], 4294967040 }
 0x5df   :  { %1374 = vsyncpa [#allocation3], 1 }
 0x5e0   :  { %1375 = vsyncpa [#allocation6], 1 }
 0x5e1   :  { %1376 = vsyncpa [#allocation9], 1 }
 0x5e2   :  { %1377 = vsyncpa [#allocation4], 1 }

</bundles_post_ra>
